<compile_context>
chip_gen: v7x
topology: tpu7x:2x2x1
jax: 0.10.0
libtpu: 0.0.40
codegen_flags: <defaults>
</compile_context>

<pallas_src>
import jax
import jax.numpy as jnp
from jax import lax
from jax.experimental import pallas as pl
from jax.experimental.pallas import tpu as pltpu

# ----------------------------- configuration --------------------------------
BATCH = 2
SEQ = 8
HIDDEN_DIM = 32
LATENT_DIM = 16
LAYER_NUM = 3
VOCAB = 32
PAD_ID = 0
BOS_ID = 1
EOS_ID = 2
CVAE = False  # non-conditional path (cond_inputs=None)


# =========================== fused Pallas kernel =============================
def _deep_vae_kernel(embx_ref, encw_ref, poolw_ref, wposth_ref, wpp_ref,
                     wlat_ref, eps_ref, latproj_ref, dectok_ref, embhv_ref,
                     labels_ref, segrows_ref, segfold_ref, stats_ref):
    f32 = jnp.float32
    L = LATENT_DIM
    L2 = 2 * LATENT_DIM
    Ln = LAYER_NUM
    B = BATCH

    # ---- phase 0+1 (z-independent): toy encoder + pooling + post_h ----------
    # TODO(synk): real encoder is an external GPT-2; toy recurrence stands in.
    h = embx_ref[...]                                        # (B, S, H)
    sent_reprs = []
    for l in range(Ln):
        h = jnp.tanh(jnp.einsum('bsh,hk->bsk', h, encw_ref[l],
                                preferred_element_type=f32))  # (B, S, H)
        # AverageSelfAttention: scores = tanh(hs @ w), softmax over S
        scores = jnp.tanh(jnp.sum(h * poolw_ref[l], axis=-1))   # (B, S)
        scores = scores - jnp.max(scores, axis=-1, keepdims=True)
        e = jnp.exp(scores)
        att = e / jnp.sum(e, axis=-1, keepdims=True)             # (B, S)
        # weighted sum over S on the MXU (avoids lane->sublane relayout + XLU reduce)
        sent = jnp.einsum('bqs,bsh->bqh', att[:, None, :], h,
                          preferred_element_type=f32)[:, 0, :]   # (B, H)
        sent_reprs.append(sent)
    sent_all = jnp.stack(sent_reprs, axis=0)                     # (Ln, B, H)
    # batched sent_repr @ W_post[:, :H] for every layer in one push
    post_h_all = jnp.einsum('lbh,lhk->lbk', sent_all, wposth_ref[...],
                            preferred_element_type=f32)          # (Ln, B, 2L)

    # ---- phase 2: serial z recurrence + per-layer KL (critical path) --------
    z = jnp.zeros((B, L), f32)
    post_z_sum = jnp.zeros((B, L), f32)
    kl_cols = []
    for l in range(Ln):
        # fused posterior(z-part) + prior matmul: (B,L) @ (L,4L)
        zp = jnp.dot(z, wpp_ref[l], preferred_element_type=f32)  # (B, 4L)
        post_out = post_h_all[l] + zp[:, :L2]                    # (B, 2L)
        prior_out = zp[:, L2:]                                   # (B, 2L)
        post_mean, post_logvar = post_out[:, :L], post_out[:, L:]
        prior_mean, prior_logvar = prior_out[:, :L], prior_out[:, L:]

        # connect(): z_post = mean + eps * exp(0.5 * logvar)   (sample=True)
        post_z = post_mean + eps_ref[l] * jnp.exp(0.5 * post_logvar)

        # compute_kl_loss: KL(q || p) summed over the latent dim
        diff = post_mean - prior_mean
        kl = 0.5 * (prior_logvar - post_logvar
                    + (jnp.exp(post_logvar) + diff * diff) * jnp.exp(-prior_logvar)
                    - 1.0)
        kl_cols.append(jnp.sum(kl, axis=-1, keepdims=True))      # (B, 1)

        post_z_sum = post_z_sum + post_z
        if l != Ln - 1:
            # latent_layer fused: tanh(concat([z, post_z]) @ vstack([W_hh, W_ih]))
            zz = jnp.concatenate([z, post_z], axis=-1)           # (B, 2L)
            z = jnp.tanh(jnp.dot(zz, wlat_ref[l], preferred_element_type=f32))

    # ---- phase 3: toy decoder reconstruction CE, vectorized over batch ------
    # TODO(synk): real decoder is an external latent-conditioned GPT-2; toy
    # decoder = token embedding + mean-latent injection + tied output proj.
    # TODO(synk): at real GPT-2 vocab sizes the logits/CE must be tiled over V
    # (grid axis + online logsumexp, sized for v7x's 64 MiB VMEM, "parallel"
    # dimension_semantics to use both v7x TensorCores); whole-array VMEM
    # residency only works at this toy V=32.
    lat = jnp.dot(post_z_sum * (1.0 / Ln), latproj_ref[...],
                  preferred_element_type=f32)                    # (B, H)
    lat_rows = jnp.dot(segrows_ref[...], lat,
                       preferred_element_type=f32)               # (B*T, H)
    h_all = dectok_ref[...] + lat_rows                           # (B*T, H)
    logits = jnp.dot(h_all, embhv_ref[...],
                     preferred_element_type=f32)                 # (B*T, V)
    m = jnp.max(logits, axis=-1, keepdims=True)
    lse = m + jnp.log(jnp.sum(jnp.exp(logits - m), axis=-1, keepdims=True))
    lab = labels_ref[...]                                        # (B*T, 1) int32
    iota_v = lax.broadcasted_iota(jnp.int32, logits.shape, 1)
    tgt = jnp.sum(jnp.where(iota_v == lab, logits, 0.0),
                  axis=-1, keepdims=True)                        # gathered logit
    mask = (lab != PAD_ID).astype(f32)                           # (B*T, 1)
    ce_rows = (lse - tgt) * mask                                 # (B*T, 1)
    rec_col = jnp.dot(segfold_ref[...], ce_rows,
                      preferred_element_type=f32)                # (B, 1)

    # ---- packed output (B, Ln+1): [KL_0..KL_{Ln-1}, rec_ce], one full store --
    col_idx = lax.broadcasted_iota(jnp.int32, (B, Ln + 1), 1)
    stats = jnp.zeros((B, Ln + 1), f32)
    for i, c in enumerate(kl_cols + [rec_col]):
        stats = stats + jnp.where(col_idx == i, c, 0.0)
    stats_ref[...] = stats


def deep_vae_fused(emb_x, enc_w, pool_w, wpost_h, wpp, wlat, eps_post,
                   lat_proj, dec_tok_flat, emb_hv, labels_flat,
                   seg_rows, seg_fold):
    B = emb_x.shape[0]
    vmem = pl.BlockSpec(memory_space=pltpu.MemorySpace.VMEM)
    return pl.pallas_call(
        _deep_vae_kernel,
        out_shape=jax.ShapeDtypeStruct((B, LAYER_NUM + 1), jnp.float32),
        in_specs=[vmem] * 13,
        out_specs=vmem,
    )(emb_x, enc_w, pool_w, wpost_h, wpp, wlat, eps_post, lat_proj,
      dec_tok_flat, emb_hv, labels_flat, seg_rows, seg_fold)


# ============================== DeepVAE glue =================================
class DeepVAEPallas:
    def __init__(self, key):
        ks = jax.random.split(key, 12)
        L, H, V, Ln = LATENT_DIM, HIDDEN_DIM, VOCAB, LAYER_NUM
        # TODO(synk): real encoder/decoder are external GPT-2 modules; toy
        # deterministic stand-ins are used for embeddings / hidden states.
        self.enc_emb = 0.02 * jax.random.normal(ks[0], (V, H), jnp.float32)
        self.enc_layers = 0.1 * jax.random.normal(ks[1], (Ln, H, H), jnp.float32)
        self.dec_emb = 0.02 * jax.random.normal(ks[2], (V, H), jnp.float32)
        self.lat_proj = 0.02 * jax.random.normal(ks[3], (L, H), jnp.float32)
        # DeepVAE parameters (PyTorch orientation (out, in); transposed below).
        self.pool_w = 0.02 * jax.random.normal(ks[4], (Ln, 1, H), jnp.float32)
        w_post = 0.02 * jax.random.normal(ks[5], (Ln, 2 * L, H + L), jnp.float32)
        w_prior = 0.02 * jax.random.normal(ks[6], (Ln, 2 * L, L), jnp.float32)
        w_hh = 0.02 * jax.random.normal(ks[7], (Ln, L, L), jnp.float32)  # last layer unused
        w_ih = 0.02 * jax.random.normal(ks[8], (Ln, L, L), jnp.float32)
        # pre-transpose / split for x @ W layout inside the kernel
        self.wpost_h = jnp.transpose(w_post[:, :, :H], (0, 2, 1))     # (Ln, H, 2L)
        wpost_z = jnp.transpose(w_post[:, :, H:], (0, 2, 1))          # (Ln, L, 2L)
        wprior = jnp.transpose(w_prior, (0, 2, 1))                    # (Ln, L, 2L)
        # fused posterior(z-part) + prior weight: one (B,L)@(L,4L) per layer
        self.wpp = jnp.concatenate([wpost_z, wprior], axis=-1)        # (Ln, L, 4L)
        whh = jnp.transpose(w_hh, (0, 2, 1))                          # (Ln, L, L)
        wih = jnp.transpose(w_ih, (0, 2, 1))                          # (Ln, L, L)
        # fused latent_layer weight: concat([z, post_z]) @ vstack([W_hh, W_ih])
        self.wlat = jnp.concatenate([whh[:Ln - 1], wih[:Ln - 1]], axis=1)  # (Ln-1, 2L, L)
        # pre-transposed output projection (tied embedding) -> natural MXU layout
        self.emb_hv = jnp.transpose(self.dec_emb)                     # (H, V)

    def forward(self, inputs, beta_kl_constraints, rng):
        Ln, B, L, H = LAYER_NUM, inputs.shape[0], LATENT_DIM, HIDDEN_DIM
        T = inputs.shape[1] - 1

        # embedded encoder tokens; the toy encoder recurrence runs inside the kernel
        emb_x = self.enc_emb[inputs]                                  # (B, S, H)

        # reparameterization noise for the posterior samples only
        # (prior z samples are never consumed by DeepVAE.forward)
        eps_post = jax.random.normal(rng, (Ln, B, L), jnp.float32)

        # decoder token embeddings + shifted next-token labels, batch-flattened
        dec_tok_flat = self.dec_emb[inputs[:, :-1]].reshape(B * T, H)  # (B*T, H)
        labels_flat = inputs[:, 1:].reshape(B * T, 1).astype(jnp.int32)
        # 0/1 segment matrices: row i belongs to sample i // T
        seg_rows = jnp.repeat(jnp.eye(B, dtype=jnp.float32), T, axis=0)  # (B*T, B)
        seg_fold = jnp.transpose(seg_rows)                               # (B, B*T)

        stats = deep_vae_fused(
            emb_x, self.enc_layers, self.pool_w, self.wpost_h, self.wpp,
            self.wlat, eps_post, self.lat_proj, dec_tok_flat, self.emb_hv,
            labels_flat, seg_rows, seg_fold)                          # (B, Ln+1)

        kl = stats[:, :Ln]                                            # (B, Ln)
        per_sample_ce = stats[:, Ln]                                  # (B,)

        # get_kl_loss
        layer_kl_loss = [kl[:, l] for l in range(Ln)]
        total_kl_loss = jnp.mean(jnp.sum(kl, axis=1)) * beta_kl_constraints

        # get_decoder_loss: divide by non-pad token count of `inputs`
        # (matches `rec_loss / torch.sum(inputs != pad_token_id, dim=1)`).
        denom = jnp.sum(inputs != PAD_ID, axis=1).astype(jnp.float32)
        rec_loss = jnp.mean(per_sample_ce / denom)

        return total_kl_loss + rec_loss, rec_loss, total_kl_loss, layer_kl_loss


# ================================== main =====================================
if __name__ == "__main__":
    key = jax.random.PRNGKey(0)
    k_param, k_data, k_eps = jax.random.split(key, 3)

    model = DeepVAEPallas(k_param)

    inputs = jax.random.randint(k_data, (BATCH, SEQ), 3, VOCAB, dtype=jnp.int32)
    inputs = inputs.at[:, 0].set(BOS_ID)
    inputs = inputs.at[0, -1].set(PAD_ID)   # exercise the pad mask
    beta_kl = 1.0

    total, rec, kl_total, layer_kl = model.forward(inputs, beta_kl, k_eps)
    jax.block_until_ready(total)
    jax.block_until_ready(rec)
    jax.block_until_ready(kl_total)
    for x in layer_kl:
        jax.block_until_ready(x)
    print("KERNEL_OK")
</pallas_src>

<mosaic_0001>
module attributes {stable_mosaic.version = 11 : i64} {
  func.func @_deep_vae_kernel(%arg0: memref<2x8x32xf32, #tpu.memory_space<vmem>>, %arg1: memref<3x32x32xf32, #tpu.memory_space<vmem>>, %arg2: memref<3x1x32xf32, #tpu.memory_space<vmem>>, %arg3: memref<3x32x32xf32, #tpu.memory_space<vmem>>, %arg4: memref<3x16x64xf32, #tpu.memory_space<vmem>>, %arg5: memref<2x32x16xf32, #tpu.memory_space<vmem>>, %arg6: memref<3x2x16xf32, #tpu.memory_space<vmem>>, %arg7: memref<16x32xf32, #tpu.memory_space<vmem>>, %arg8: memref<14x32xf32, #tpu.memory_space<vmem>>, %arg9: memref<32x32xf32, #tpu.memory_space<vmem>>, %arg10: memref<14x1xi32, #tpu.memory_space<vmem>>, %arg11: memref<14x2xf32, #tpu.memory_space<vmem>>, %arg12: memref<2x14xf32, #tpu.memory_space<vmem>>, %arg13: memref<2x4xf32, #tpu.memory_space<vmem>>) attributes {dimension_semantics = [], scalar_prefetch = 0 : i64, scratch_operands = 0 : i64, tpu.core_type = #tpu.core_type<tc>} {
    %c0 = arith.constant 0 : index
    %c0_0 = arith.constant 0 : index
    %c0_1 = arith.constant 0 : index
    %0 = vector.load %arg0[%c0, %c0_0, %c0_1] : memref<2x8x32xf32, #tpu.memory_space<vmem>>, vector<2x8x32xf32>
    %c0_2 = arith.constant 0 : index
    %c0_3 = arith.constant 0 : index
    %c0_4 = arith.constant 0 : index
    %1 = vector.load %arg1[%c0_2, %c0_3, %c0_4] : memref<3x32x32xf32, #tpu.memory_space<vmem>>, vector<1x32x32xf32>
    %2 = vector.shape_cast %1 : vector<1x32x32xf32> to vector<32x32xf32>
    "tpu.trace_start"() <{level = 10 : i32, message = "bsh,hk->bsk"}> : () -> ()
    %cst = arith.constant dense<0.000000e+00> : vector<2x8x32xf32>
    %3 = tpu.matmul %0, %2, %cst {dimension_numbers = #tpu.dot_dimension_numbers<[2], [0], [0, 1], [1], [0, 0, 0, 1, 1, 1], [], []>} : vector<2x8x32xf32>, vector<32x32xf32>, vector<2x8x32xf32> -> vector<2x8x32xf32>
    "tpu.trace_stop"() : () -> ()
    %4 = math.tanh %3 : vector<2x8x32xf32>
    %c0_5 = arith.constant 0 : index
    %c0_6 = arith.constant 0 : index
    %c0_7 = arith.constant 0 : index
    %5 = vector.load %arg2[%c0_5, %c0_6, %c0_7] : memref<3x1x32xf32, #tpu.memory_space<vmem>>, vector<1x1x32xf32>
    %6 = vector.shape_cast %5 : vector<1x1x32xf32> to vector<1x32xf32>
    %7 = vector.shape_cast %6 : vector<1x32xf32> to vector<1x1x32xf32>
    %8 = vector.broadcast %7 : vector<1x1x32xf32> to vector<2x8x32xf32>
    %9 = arith.mulf %4, %8 : vector<2x8x32xf32>
    %cst_8 = arith.constant dense<0.000000e+00> : vector<2x8xf32>
    %10 = vector.multi_reduction <add>, %9, %cst_8 [2] : vector<2x8x32xf32> to vector<2x8xf32>
    %11 = math.tanh %10 : vector<2x8xf32>
    %cst_9 = arith.constant dense<0xFF800000> : vector<2xf32>
    %12 = vector.multi_reduction <maximumf>, %11, %cst_9 [1] : vector<2x8xf32> to vector<2xf32>
    %13 = vector.shape_cast %12 : vector<2xf32> to vector<2x1xf32>
    %14 = vector.broadcast %13 : vector<2x1xf32> to vector<2x8xf32>
    %15 = arith.subf %11, %14 : vector<2x8xf32>
    %16 = math.exp %15 : vector<2x8xf32>
    %cst_10 = arith.constant dense<0.000000e+00> : vector<2xf32>
    %17 = vector.multi_reduction <add>, %16, %cst_10 [1] : vector<2x8xf32> to vector<2xf32>
    %18 = vector.shape_cast %17 : vector<2xf32> to vector<2x1xf32>
    %19 = vector.broadcast %18 : vector<2x1xf32> to vector<2x8xf32>
    %20 = arith.divf %16, %19 : vector<2x8xf32>
    %21 = vector.shape_cast %20 : vector<2x8xf32> to vector<2x1x8xf32>
    "tpu.trace_start"() <{level = 10 : i32, message = "bqs,bsh->bqh"}> : () -> ()
    %cst_11 = arith.constant dense<0.000000e+00> : vector<2x1x32xf32>
    %22 = tpu.matmul %21, %4, %cst_11 {dimension_numbers = #tpu.dot_dimension_numbers<[2], [1], [1], [2], [0, 0, 0, 1, 1, 2], [0], [0]>} : vector<2x1x8xf32>, vector<2x8x32xf32>, vector<2x1x32xf32> -> vector<2x1x32xf32>
    "tpu.trace_stop"() : () -> ()
    %23 = vector.shape_cast %22 : vector<2x1x32xf32> to vector<2x32xf32>
    %c1 = arith.constant 1 : index
    %c0_12 = arith.constant 0 : index
    %c0_13 = arith.constant 0 : index
    %24 = vector.load %arg1[%c1, %c0_12, %c0_13] : memref<3x32x32xf32, #tpu.memory_space<vmem>>, vector<1x32x32xf32>
    %25 = vector.shape_cast %24 : vector<1x32x32xf32> to vector<32x32xf32>
    "tpu.trace_start"() <{level = 10 : i32, message = "bsh,hk->bsk"}> : () -> ()
    %cst_14 = arith.constant dense<0.000000e+00> : vector<2x8x32xf32>
    %26 = tpu.matmul %4, %25, %cst_14 {dimension_numbers = #tpu.dot_dimension_numbers<[2], [0], [0, 1], [1], [0, 0, 0, 1, 1, 1], [], []>} : vector<2x8x32xf32>, vector<32x32xf32>, vector<2x8x32xf32> -> vector<2x8x32xf32>
    "tpu.trace_stop"() : () -> ()
    %27 = math.tanh %26 : vector<2x8x32xf32>
    %c1_15 = arith.constant 1 : index
    %c0_16 = arith.constant 0 : index
    %c0_17 = arith.constant 0 : index
    %28 = vector.load %arg2[%c1_15, %c0_16, %c0_17] : memref<3x1x32xf32, #tpu.memory_space<vmem>>, vector<1x1x32xf32>
    %29 = vector.shape_cast %28 : vector<1x1x32xf32> to vector<1x32xf32>
    %30 = vector.shape_cast %29 : vector<1x32xf32> to vector<1x1x32xf32>
    %31 = vector.broadcast %30 : vector<1x1x32xf32> to vector<2x8x32xf32>
    %32 = arith.mulf %27, %31 : vector<2x8x32xf32>
    %cst_18 = arith.constant dense<0.000000e+00> : vector<2x8xf32>
    %33 = vector.multi_reduction <add>, %32, %cst_18 [2] : vector<2x8x32xf32> to vector<2x8xf32>
    %34 = math.tanh %33 : vector<2x8xf32>
    %cst_19 = arith.constant dense<0xFF800000> : vector<2xf32>
    %35 = vector.multi_reduction <maximumf>, %34, %cst_19 [1] : vector<2x8xf32> to vector<2xf32>
    %36 = vector.shape_cast %35 : vector<2xf32> to vector<2x1xf32>
    %37 = vector.broadcast %36 : vector<2x1xf32> to vector<2x8xf32>
    %38 = arith.subf %34, %37 : vector<2x8xf32>
    %39 = math.exp %38 : vector<2x8xf32>
    %cst_20 = arith.constant dense<0.000000e+00> : vector<2xf32>
    %40 = vector.multi_reduction <add>, %39, %cst_20 [1] : vector<2x8xf32> to vector<2xf32>
    %41 = vector.shape_cast %40 : vector<2xf32> to vector<2x1xf32>
    %42 = vector.broadcast %41 : vector<2x1xf32> to vector<2x8xf32>
    %43 = arith.divf %39, %42 : vector<2x8xf32>
    %44 = vector.shape_cast %43 : vector<2x8xf32> to vector<2x1x8xf32>
    "tpu.trace_start"() <{level = 10 : i32, message = "bqs,bsh->bqh"}> : () -> ()
    %cst_21 = arith.constant dense<0.000000e+00> : vector<2x1x32xf32>
    %45 = tpu.matmul %44, %27, %cst_21 {dimension_numbers = #tpu.dot_dimension_numbers<[2], [1], [1], [2], [0, 0, 0, 1, 1, 2], [0], [0]>} : vector<2x1x8xf32>, vector<2x8x32xf32>, vector<2x1x32xf32> -> vector<2x1x32xf32>
    "tpu.trace_stop"() : () -> ()
    %46 = vector.shape_cast %45 : vector<2x1x32xf32> to vector<2x32xf32>
    %c2 = arith.constant 2 : index
    %c0_22 = arith.constant 0 : index
    %c0_23 = arith.constant 0 : index
    %47 = vector.load %arg1[%c2, %c0_22, %c0_23] : memref<3x32x32xf32, #tpu.memory_space<vmem>>, vector<1x32x32xf32>
    %48 = vector.shape_cast %47 : vector<1x32x32xf32> to vector<32x32xf32>
    "tpu.trace_start"() <{level = 10 : i32, message = "bsh,hk->bsk"}> : () -> ()
    %cst_24 = arith.constant dense<0.000000e+00> : vector<2x8x32xf32>
    %49 = tpu.matmul %27, %48, %cst_24 {dimension_numbers = #tpu.dot_dimension_numbers<[2], [0], [0, 1], [1], [0, 0, 0, 1, 1, 1], [], []>} : vector<2x8x32xf32>, vector<32x32xf32>, vector<2x8x32xf32> -> vector<2x8x32xf32>
    "tpu.trace_stop"() : () -> ()
    %50 = math.tanh %49 : vector<2x8x32xf32>
    %c2_25 = arith.constant 2 : index
    %c0_26 = arith.constant 0 : index
    %c0_27 = arith.constant 0 : index
    %51 = vector.load %arg2[%c2_25, %c0_26, %c0_27] : memref<3x1x32xf32, #tpu.memory_space<vmem>>, vector<1x1x32xf32>
    %52 = vector.shape_cast %51 : vector<1x1x32xf32> to vector<1x32xf32>
    %53 = vector.shape_cast %52 : vector<1x32xf32> to vector<1x1x32xf32>
    %54 = vector.broadcast %53 : vector<1x1x32xf32> to vector<2x8x32xf32>
    %55 = arith.mulf %50, %54 : vector<2x8x32xf32>
    %cst_28 = arith.constant dense<0.000000e+00> : vector<2x8xf32>
    %56 = vector.multi_reduction <add>, %55, %cst_28 [2] : vector<2x8x32xf32> to vector<2x8xf32>
    %57 = math.tanh %56 : vector<2x8xf32>
    %cst_29 = arith.constant dense<0xFF800000> : vector<2xf32>
    %58 = vector.multi_reduction <maximumf>, %57, %cst_29 [1] : vector<2x8xf32> to vector<2xf32>
    %59 = vector.shape_cast %58 : vector<2xf32> to vector<2x1xf32>
    %60 = vector.broadcast %59 : vector<2x1xf32> to vector<2x8xf32>
    %61 = arith.subf %57, %60 : vector<2x8xf32>
    %62 = math.exp %61 : vector<2x8xf32>
    %cst_30 = arith.constant dense<0.000000e+00> : vector<2xf32>
    %63 = vector.multi_reduction <add>, %62, %cst_30 [1] : vector<2x8xf32> to vector<2xf32>
    %64 = vector.shape_cast %63 : vector<2xf32> to vector<2x1xf32>
    %65 = vector.broadcast %64 : vector<2x1xf32> to vector<2x8xf32>
    %66 = arith.divf %62, %65 : vector<2x8xf32>
    %67 = vector.shape_cast %66 : vector<2x8xf32> to vector<2x1x8xf32>
    "tpu.trace_start"() <{level = 10 : i32, message = "bqs,bsh->bqh"}> : () -> ()
    %cst_31 = arith.constant dense<0.000000e+00> : vector<2x1x32xf32>
    %68 = tpu.matmul %67, %50, %cst_31 {dimension_numbers = #tpu.dot_dimension_numbers<[2], [1], [1], [2], [0, 0, 0, 1, 1, 2], [0], [0]>} : vector<2x1x8xf32>, vector<2x8x32xf32>, vector<2x1x32xf32> -> vector<2x1x32xf32>
    "tpu.trace_stop"() : () -> ()
    %69 = vector.shape_cast %68 : vector<2x1x32xf32> to vector<2x32xf32>
    %70 = vector.shape_cast %23 : vector<2x32xf32> to vector<1x2x32xf32>
    %71 = vector.shape_cast %46 : vector<2x32xf32> to vector<1x2x32xf32>
    %72 = vector.shape_cast %69 : vector<2x32xf32> to vector<1x2x32xf32>
    %73 = tpu.concatenate %70, %71, %72 in 0 : vector<1x2x32xf32>, vector<1x2x32xf32>, vector<1x2x32xf32> -> vector<3x2x32xf32>
    %c0_32 = arith.constant 0 : index
    %c0_33 = arith.constant 0 : index
    %c0_34 = arith.constant 0 : index
    %74 = vector.load %arg3[%c0_32, %c0_33, %c0_34] : memref<3x32x32xf32, #tpu.memory_space<vmem>>, vector<3x32x32xf32>
    "tpu.trace_start"() <{level = 10 : i32, message = "lbh,lhk->lbk"}> : () -> ()
    %cst_35 = arith.constant dense<0.000000e+00> : vector<3x2x32xf32>
    %75 = tpu.matmul %73, %74, %cst_35 {dimension_numbers = #tpu.dot_dimension_numbers<[2], [1], [1], [2], [0, 0, 0, 1, 1, 2], [0], [0]>} : vector<3x2x32xf32>, vector<3x32x32xf32>, vector<3x2x32xf32> -> vector<3x2x32xf32>
    %cst_36 = arith.constant 0.000000e+00 : f32
    "tpu.trace_stop"() : () -> ()
    %76 = vector.broadcast %cst_36 : f32 to vector<2x16xf32>
    %cst_37 = arith.constant 0.000000e+00 : f32
    %77 = vector.broadcast %cst_37 : f32 to vector<2x16xf32>
    %c0_38 = arith.constant 0 : index
    %c0_39 = arith.constant 0 : index
    %c0_40 = arith.constant 0 : index
    %78 = vector.load %arg4[%c0_38, %c0_39, %c0_40] : memref<3x16x64xf32, #tpu.memory_space<vmem>>, vector<1x16x64xf32>
    %79 = vector.shape_cast %78 : vector<1x16x64xf32> to vector<16x64xf32>
    %cst_41 = arith.constant dense<0.000000e+00> : vector<2x64xf32>
    %80 = tpu.matmul %76, %79, %cst_41 {dimension_numbers = #tpu.dot_dimension_numbers<[1], [0], [0], [1], [0, 0, 1, 1], [], []>} : vector<2x16xf32>, vector<16x64xf32>, vector<2x64xf32> -> vector<2x64xf32>
    %81 = vector.extract_strided_slice %75 {offsets = [0, 0, 0], sizes = [1, 2, 32], strides = [1, 1, 1]} : vector<3x2x32xf32> to vector<1x2x32xf32>
    %82 = vector.shape_cast %81 : vector<1x2x32xf32> to vector<2x32xf32>
    %83 = vector.extract_strided_slice %80 {offsets = [0, 0], sizes = [2, 32], strides = [1, 1]} : vector<2x64xf32> to vector<2x32xf32>
    %84 = arith.addf %82, %83 : vector<2x32xf32>
    %85 = vector.extract_strided_slice %80 {offsets = [0, 32], sizes = [2, 32], strides = [1, 1]} : vector<2x64xf32> to vector<2x32xf32>
    %86 = vector.extract_strided_slice %84 {offsets = [0, 0], sizes = [2, 16], strides = [1, 1]} : vector<2x32xf32> to vector<2x16xf32>
    %87 = vector.extract_strided_slice %84 {offsets = [0, 16], sizes = [2, 16], strides = [1, 1]} : vector<2x32xf32> to vector<2x16xf32>
    %88 = vector.extract_strided_slice %85 {offsets = [0, 0], sizes = [2, 16], strides = [1, 1]} : vector<2x32xf32> to vector<2x16xf32>
    %89 = vector.extract_strided_slice %85 {offsets = [0, 16], sizes = [2, 16], strides = [1, 1]} : vector<2x32xf32> to vector<2x16xf32>
    %c0_42 = arith.constant 0 : index
    %c0_43 = arith.constant 0 : index
    %c0_44 = arith.constant 0 : index
    %90 = vector.load %arg6[%c0_42, %c0_43, %c0_44] : memref<3x2x16xf32, #tpu.memory_space<vmem>>, vector<1x2x16xf32>
    %91 = vector.shape_cast %90 : vector<1x2x16xf32> to vector<2x16xf32>
    %cst_45 = arith.constant 5.000000e-01 : f32
    %92 = vector.broadcast %cst_45 : f32 to vector<2x16xf32>
    %93 = arith.mulf %92, %87 : vector<2x16xf32>
    %94 = math.exp %93 : vector<2x16xf32>
    %95 = arith.mulf %91, %94 : vector<2x16xf32>
    %96 = arith.addf %86, %95 : vector<2x16xf32>
    %97 = arith.subf %86, %88 : vector<2x16xf32>
    %98 = arith.subf %89, %87 : vector<2x16xf32>
    %99 = math.exp %87 : vector<2x16xf32>
    %100 = arith.mulf %97, %97 : vector<2x16xf32>
    %101 = arith.addf %99, %100 : vector<2x16xf32>
    %cst_46 = arith.constant 0.000000e+00 : f32
    %102 = vector.broadcast %cst_46 : f32 to vector<2x16xf32>
    %103 = arith.subf %102, %89 : vector<2x16xf32>
    %104 = math.exp %103 : vector<2x16xf32>
    %105 = arith.mulf %101, %104 : vector<2x16xf32>
    %106 = arith.addf %98, %105 : vector<2x16xf32>
    %cst_47 = arith.constant 1.000000e+00 : f32
    %107 = vector.broadcast %cst_47 : f32 to vector<2x16xf32>
    %108 = arith.subf %106, %107 : vector<2x16xf32>
    %cst_48 = arith.constant 5.000000e-01 : f32
    %109 = vector.broadcast %cst_48 : f32 to vector<2x16xf32>
    %110 = arith.mulf %109, %108 : vector<2x16xf32>
    %cst_49 = arith.constant dense<0.000000e+00> : vector<2xf32>
    %111 = vector.multi_reduction <add>, %110, %cst_49 [1] : vector<2x16xf32> to vector<2xf32>
    %112 = vector.shape_cast %111 : vector<2xf32> to vector<2x1xf32>
    %113 = arith.addf %77, %96 : vector<2x16xf32>
    %114 = tpu.concatenate %76, %96 in 1 : vector<2x16xf32>, vector<2x16xf32> -> vector<2x32xf32>
    %c0_50 = arith.constant 0 : index
    %c0_51 = arith.constant 0 : index
    %c0_52 = arith.constant 0 : index
    %115 = vector.load %arg5[%c0_50, %c0_51, %c0_52] : memref<2x32x16xf32, #tpu.memory_space<vmem>>, vector<1x32x16xf32>
    %116 = vector.shape_cast %115 : vector<1x32x16xf32> to vector<32x16xf32>
    %cst_53 = arith.constant dense<0.000000e+00> : vector<2x16xf32>
    %117 = tpu.matmul %114, %116, %cst_53 {dimension_numbers = #tpu.dot_dimension_numbers<[1], [0], [0], [1], [0, 0, 1, 1], [], []>} : vector<2x32xf32>, vector<32x16xf32>, vector<2x16xf32> -> vector<2x16xf32>
    %118 = math.tanh %117 : vector<2x16xf32>
    %c1_54 = arith.constant 1 : index
    %c0_55 = arith.constant 0 : index
    %c0_56 = arith.constant 0 : index
    %119 = vector.load %arg4[%c1_54, %c0_55, %c0_56] : memref<3x16x64xf32, #tpu.memory_space<vmem>>, vector<1x16x64xf32>
    %120 = vector.shape_cast %119 : vector<1x16x64xf32> to vector<16x64xf32>
    %cst_57 = arith.constant dense<0.000000e+00> : vector<2x64xf32>
    %121 = tpu.matmul %118, %120, %cst_57 {dimension_numbers = #tpu.dot_dimension_numbers<[1], [0], [0], [1], [0, 0, 1, 1], [], []>} : vector<2x16xf32>, vector<16x64xf32>, vector<2x64xf32> -> vector<2x64xf32>
    %122 = vector.extract_strided_slice %75 {offsets = [1, 0, 0], sizes = [1, 2, 32], strides = [1, 1, 1]} : vector<3x2x32xf32> to vector<1x2x32xf32>
    %123 = vector.shape_cast %122 : vector<1x2x32xf32> to vector<2x32xf32>
    %124 = vector.extract_strided_slice %121 {offsets = [0, 0], sizes = [2, 32], strides = [1, 1]} : vector<2x64xf32> to vector<2x32xf32>
    %125 = arith.addf %123, %124 : vector<2x32xf32>
    %126 = vector.extract_strided_slice %121 {offsets = [0, 32], sizes = [2, 32], strides = [1, 1]} : vector<2x64xf32> to vector<2x32xf32>
    %127 = vector.extract_strided_slice %125 {offsets = [0, 0], sizes = [2, 16], strides = [1, 1]} : vector<2x32xf32> to vector<2x16xf32>
    %128 = vector.extract_strided_slice %125 {offsets = [0, 16], sizes = [2, 16], strides = [1, 1]} : vector<2x32xf32> to vector<2x16xf32>
    %129 = vector.extract_strided_slice %126 {offsets = [0, 0], sizes = [2, 16], strides = [1, 1]} : vector<2x32xf32> to vector<2x16xf32>
    %130 = vector.extract_strided_slice %126 {offsets = [0, 16], sizes = [2, 16], strides = [1, 1]} : vector<2x32xf32> to vector<2x16xf32>
    %c1_58 = arith.constant 1 : index
    %c0_59 = arith.constant 0 : index
    %c0_60 = arith.constant 0 : index
    %131 = vector.load %arg6[%c1_58, %c0_59, %c0_60] : memref<3x2x16xf32, #tpu.memory_space<vmem>>, vector<1x2x16xf32>
    %132 = vector.shape_cast %131 : vector<1x2x16xf32> to vector<2x16xf32>
    %cst_61 = arith.constant 5.000000e-01 : f32
    %133 = vector.broadcast %cst_61 : f32 to vector<2x16xf32>
    %134 = arith.mulf %133, %128 : vector<2x16xf32>
    %135 = math.exp %134 : vector<2x16xf32>
    %136 = arith.mulf %132, %135 : vector<2x16xf32>
    %137 = arith.addf %127, %136 : vector<2x16xf32>
    %138 = arith.subf %127, %129 : vector<2x16xf32>
    %139 = arith.subf %130, %128 : vector<2x16xf32>
    %140 = math.exp %128 : vector<2x16xf32>
    %141 = arith.mulf %138, %138 : vector<2x16xf32>
    %142 = arith.addf %140, %141 : vector<2x16xf32>
    %cst_62 = arith.constant 0.000000e+00 : f32
    %143 = vector.broadcast %cst_62 : f32 to vector<2x16xf32>
    %144 = arith.subf %143, %130 : vector<2x16xf32>
    %145 = math.exp %144 : vector<2x16xf32>
    %146 = arith.mulf %142, %145 : vector<2x16xf32>
    %147 = arith.addf %139, %146 : vector<2x16xf32>
    %cst_63 = arith.constant 1.000000e+00 : f32
    %148 = vector.broadcast %cst_63 : f32 to vector<2x16xf32>
    %149 = arith.subf %147, %148 : vector<2x16xf32>
    %cst_64 = arith.constant 5.000000e-01 : f32
    %150 = vector.broadcast %cst_64 : f32 to vector<2x16xf32>
    %151 = arith.mulf %150, %149 : vector<2x16xf32>
    %cst_65 = arith.constant dense<0.000000e+00> : vector<2xf32>
    %152 = vector.multi_reduction <add>, %151, %cst_65 [1] : vector<2x16xf32> to vector<2xf32>
    %153 = vector.shape_cast %152 : vector<2xf32> to vector<2x1xf32>
    %154 = arith.addf %113, %137 : vector<2x16xf32>
    %155 = tpu.concatenate %118, %137 in 1 : vector<2x16xf32>, vector<2x16xf32> -> vector<2x32xf32>
    %c1_66 = arith.constant 1 : index
    %c0_67 = arith.constant 0 : index
    %c0_68 = arith.constant 0 : index
    %156 = vector.load %arg5[%c1_66, %c0_67, %c0_68] : memref<2x32x16xf32, #tpu.memory_space<vmem>>, vector<1x32x16xf32>
    %157 = vector.shape_cast %156 : vector<1x32x16xf32> to vector<32x16xf32>
    %cst_69 = arith.constant dense<0.000000e+00> : vector<2x16xf32>
    %158 = tpu.matmul %155, %157, %cst_69 {dimension_numbers = #tpu.dot_dimension_numbers<[1], [0], [0], [1], [0, 0, 1, 1], [], []>} : vector<2x32xf32>, vector<32x16xf32>, vector<2x16xf32> -> vector<2x16xf32>
    %159 = math.tanh %158 : vector<2x16xf32>
    %c2_70 = arith.constant 2 : index
    %c0_71 = arith.constant 0 : index
    %c0_72 = arith.constant 0 : index
    %160 = vector.load %arg4[%c2_70, %c0_71, %c0_72] : memref<3x16x64xf32, #tpu.memory_space<vmem>>, vector<1x16x64xf32>
    %161 = vector.shape_cast %160 : vector<1x16x64xf32> to vector<16x64xf32>
    %cst_73 = arith.constant dense<0.000000e+00> : vector<2x64xf32>
    %162 = tpu.matmul %159, %161, %cst_73 {dimension_numbers = #tpu.dot_dimension_numbers<[1], [0], [0], [1], [0, 0, 1, 1], [], []>} : vector<2x16xf32>, vector<16x64xf32>, vector<2x64xf32> -> vector<2x64xf32>
    %163 = vector.extract_strided_slice %75 {offsets = [2, 0, 0], sizes = [1, 2, 32], strides = [1, 1, 1]} : vector<3x2x32xf32> to vector<1x2x32xf32>
    %164 = vector.shape_cast %163 : vector<1x2x32xf32> to vector<2x32xf32>
    %165 = vector.extract_strided_slice %162 {offsets = [0, 0], sizes = [2, 32], strides = [1, 1]} : vector<2x64xf32> to vector<2x32xf32>
    %166 = arith.addf %164, %165 : vector<2x32xf32>
    %167 = vector.extract_strided_slice %162 {offsets = [0, 32], sizes = [2, 32], strides = [1, 1]} : vector<2x64xf32> to vector<2x32xf32>
    %168 = vector.extract_strided_slice %166 {offsets = [0, 0], sizes = [2, 16], strides = [1, 1]} : vector<2x32xf32> to vector<2x16xf32>
    %169 = vector.extract_strided_slice %166 {offsets = [0, 16], sizes = [2, 16], strides = [1, 1]} : vector<2x32xf32> to vector<2x16xf32>
    %170 = vector.extract_strided_slice %167 {offsets = [0, 0], sizes = [2, 16], strides = [1, 1]} : vector<2x32xf32> to vector<2x16xf32>
    %171 = vector.extract_strided_slice %167 {offsets = [0, 16], sizes = [2, 16], strides = [1, 1]} : vector<2x32xf32> to vector<2x16xf32>
    %c2_74 = arith.constant 2 : index
    %c0_75 = arith.constant 0 : index
    %c0_76 = arith.constant 0 : index
    %172 = vector.load %arg6[%c2_74, %c0_75, %c0_76] : memref<3x2x16xf32, #tpu.memory_space<vmem>>, vector<1x2x16xf32>
    %173 = vector.shape_cast %172 : vector<1x2x16xf32> to vector<2x16xf32>
    %cst_77 = arith.constant 5.000000e-01 : f32
    %174 = vector.broadcast %cst_77 : f32 to vector<2x16xf32>
    %175 = arith.mulf %174, %169 : vector<2x16xf32>
    %176 = math.exp %175 : vector<2x16xf32>
    %177 = arith.mulf %173, %176 : vector<2x16xf32>
    %178 = arith.addf %168, %177 : vector<2x16xf32>
    %179 = arith.subf %168, %170 : vector<2x16xf32>
    %180 = arith.subf %171, %169 : vector<2x16xf32>
    %181 = math.exp %169 : vector<2x16xf32>
    %182 = arith.mulf %179, %179 : vector<2x16xf32>
    %183 = arith.addf %181, %182 : vector<2x16xf32>
    %cst_78 = arith.constant 0.000000e+00 : f32
    %184 = vector.broadcast %cst_78 : f32 to vector<2x16xf32>
    %185 = arith.subf %184, %171 : vector<2x16xf32>
    %186 = math.exp %185 : vector<2x16xf32>
    %187 = arith.mulf %183, %186 : vector<2x16xf32>
    %188 = arith.addf %180, %187 : vector<2x16xf32>
    %cst_79 = arith.constant 1.000000e+00 : f32
    %189 = vector.broadcast %cst_79 : f32 to vector<2x16xf32>
    %190 = arith.subf %188, %189 : vector<2x16xf32>
    %cst_80 = arith.constant 5.000000e-01 : f32
    %191 = vector.broadcast %cst_80 : f32 to vector<2x16xf32>
    %192 = arith.mulf %191, %190 : vector<2x16xf32>
    %cst_81 = arith.constant dense<0.000000e+00> : vector<2xf32>
    %193 = vector.multi_reduction <add>, %192, %cst_81 [1] : vector<2x16xf32> to vector<2xf32>
    %194 = vector.shape_cast %193 : vector<2xf32> to vector<2x1xf32>
    %195 = arith.addf %154, %178 : vector<2x16xf32>
    %cst_82 = arith.constant 0.333333343 : f32
    %196 = vector.broadcast %cst_82 : f32 to vector<2x16xf32>
    %197 = arith.mulf %195, %196 : vector<2x16xf32>
    %c0_83 = arith.constant 0 : index
    %c0_84 = arith.constant 0 : index
    %198 = vector.load %arg7[%c0_83, %c0_84] : memref<16x32xf32, #tpu.memory_space<vmem>>, vector<16x32xf32>
    %cst_85 = arith.constant dense<0.000000e+00> : vector<2x32xf32>
    %199 = tpu.matmul %197, %198, %cst_85 {dimension_numbers = #tpu.dot_dimension_numbers<[1], [0], [0], [1], [0, 0, 1, 1], [], []>} : vector<2x16xf32>, vector<16x32xf32>, vector<2x32xf32> -> vector<2x32xf32>
    %c0_86 = arith.constant 0 : index
    %c0_87 = arith.constant 0 : index
    %200 = vector.load %arg11[%c0_86, %c0_87] : memref<14x2xf32, #tpu.memory_space<vmem>>, vector<14x2xf32>
    %cst_88 = arith.constant dense<0.000000e+00> : vector<14x32xf32>
    %201 = tpu.matmul %200, %199, %cst_88 {dimension_numbers = #tpu.dot_dimension_numbers<[1], [0], [0], [1], [0, 0, 1, 1], [], []>} : vector<14x2xf32>, vector<2x32xf32>, vector<14x32xf32> -> vector<14x32xf32>
    %c0_89 = arith.constant 0 : index
    %c0_90 = arith.constant 0 : index
    %202 = vector.load %arg8[%c0_89, %c0_90] : memref<14x32xf32, #tpu.memory_space<vmem>>, vector<14x32xf32>
    %203 = arith.addf %202, %201 : vector<14x32xf32>
    %c0_91 = arith.constant 0 : index
    %c0_92 = arith.constant 0 : index
    %204 = vector.load %arg9[%c0_91, %c0_92] : memref<32x32xf32, #tpu.memory_space<vmem>>, vector<32x32xf32>
    %cst_93 = arith.constant dense<0.000000e+00> : vector<14x32xf32>
    %205 = tpu.matmul %203, %204, %cst_93 {dimension_numbers = #tpu.dot_dimension_numbers<[1], [0], [0], [1], [0, 0, 1, 1], [], []>} : vector<14x32xf32>, vector<32x32xf32>, vector<14x32xf32> -> vector<14x32xf32>
    %cst_94 = arith.constant dense<0xFF800000> : vector<14xf32>
    %206 = vector.multi_reduction <maximumf>, %205, %cst_94 [1] : vector<14x32xf32> to vector<14xf32>
    %207 = vector.shape_cast %206 : vector<14xf32> to vector<14x1xf32>
    %208 = vector.broadcast %207 : vector<14x1xf32> to vector<14x32xf32>
    %209 = arith.subf %205, %208 : vector<14x32xf32>
    %210 = math.exp %209 : vector<14x32xf32>
    %cst_95 = arith.constant dense<0.000000e+00> : vector<14xf32>
    %211 = vector.multi_reduction <add>, %210, %cst_95 [1] : vector<14x32xf32> to vector<14xf32>
    %212 = vector.shape_cast %211 : vector<14xf32> to vector<14x1xf32>
    %213 = math.log %212 : vector<14x1xf32>
    %214 = arith.addf %207, %213 : vector<14x1xf32>
    %c0_96 = arith.constant 0 : index
    %c0_97 = arith.constant 0 : index
    %215 = vector.load %arg10[%c0_96, %c0_97] : memref<14x1xi32, #tpu.memory_space<vmem>>, vector<14x1xi32>
    %216 = tpu.iota {dimensions = array<i32: 1>} : vector<14x32xi32>
    %217 = vector.broadcast %215 : vector<14x1xi32> to vector<14x32xi32>
    %218 = arith.cmpi eq, %216, %217 : vector<14x32xi32>
    %cst_98 = arith.constant 0.000000e+00 : f32
    %219 = vector.broadcast %cst_98 : f32 to vector<14x32xf32>
    %220 = arith.select %218, %205, %219 : vector<14x32xi1>, vector<14x32xf32>
    %cst_99 = arith.constant dense<0.000000e+00> : vector<14xf32>
    %221 = vector.multi_reduction <add>, %220, %cst_99 [1] : vector<14x32xf32> to vector<14xf32>
    %222 = vector.shape_cast %221 : vector<14xf32> to vector<14x1xf32>
    %c0_i32 = arith.constant 0 : i32
    %223 = vector.broadcast %c0_i32 : i32 to vector<14x1xi32>
    %224 = arith.cmpi ne, %215, %223 : vector<14x1xi32>
    %225 = arith.extui %224 : vector<14x1xi1> to vector<14x1xi32>
    %226 = arith.sitofp %225 : vector<14x1xi32> to vector<14x1xf32>
    %227 = arith.subf %214, %222 : vector<14x1xf32>
    %228 = arith.mulf %227, %226 : vector<14x1xf32>
    %c0_100 = arith.constant 0 : index
    %c0_101 = arith.constant 0 : index
    %229 = vector.load %arg12[%c0_100, %c0_101] : memref<2x14xf32, #tpu.memory_space<vmem>>, vector<2x14xf32>
    %cst_102 = arith.constant dense<0.000000e+00> : vector<2x1xf32>
    %230 = tpu.matmul %229, %228, %cst_102 {dimension_numbers = #tpu.dot_dimension_numbers<[1], [0], [0], [1], [0, 0, 1, 1], [], []>} : vector<2x14xf32>, vector<14x1xf32>, vector<2x1xf32> -> vector<2x1xf32>
    %231 = tpu.iota {dimensions = array<i32: 1>} : vector<2x4xi32>
    %cst_103 = arith.constant 0.000000e+00 : f32
    %232 = vector.broadcast %cst_103 : f32 to vector<2x4xf32>
    %c0_i32_104 = arith.constant 0 : i32
    %233 = vector.broadcast %c0_i32_104 : i32 to vector<2x4xi32>
    %234 = arith.cmpi eq, %231, %233 : vector<2x4xi32>
    %cst_105 = arith.constant 0.000000e+00 : f32
    %235 = vector.shape_cast %112 : vector<2x1xf32> to vector<2x1xf32>
    %236 = vector.broadcast %235 : vector<2x1xf32> to vector<2x4xf32>
    %237 = vector.broadcast %cst_105 : f32 to vector<2x4xf32>
    %238 = arith.select %234, %236, %237 : vector<2x4xi1>, vector<2x4xf32>
    %239 = arith.addf %232, %238 : vector<2x4xf32>
    %c1_i32 = arith.constant 1 : i32
    %240 = vector.broadcast %c1_i32 : i32 to vector<2x4xi32>
    %241 = arith.cmpi eq, %231, %240 : vector<2x4xi32>
    %cst_106 = arith.constant 0.000000e+00 : f32
    %242 = vector.shape_cast %153 : vector<2x1xf32> to vector<2x1xf32>
    %243 = vector.broadcast %242 : vector<2x1xf32> to vector<2x4xf32>
    %244 = vector.broadcast %cst_106 : f32 to vector<2x4xf32>
    %245 = arith.select %241, %243, %244 : vector<2x4xi1>, vector<2x4xf32>
    %246 = arith.addf %239, %245 : vector<2x4xf32>
    %c2_i32 = arith.constant 2 : i32
    %247 = vector.broadcast %c2_i32 : i32 to vector<2x4xi32>
    %248 = arith.cmpi eq, %231, %247 : vector<2x4xi32>
    %cst_107 = arith.constant 0.000000e+00 : f32
    %249 = vector.shape_cast %194 : vector<2x1xf32> to vector<2x1xf32>
    %250 = vector.broadcast %249 : vector<2x1xf32> to vector<2x4xf32>
    %251 = vector.broadcast %cst_107 : f32 to vector<2x4xf32>
    %252 = arith.select %248, %250, %251 : vector<2x4xi1>, vector<2x4xf32>
    %253 = arith.addf %246, %252 : vector<2x4xf32>
    %c3_i32 = arith.constant 3 : i32
    %254 = vector.broadcast %c3_i32 : i32 to vector<2x4xi32>
    %255 = arith.cmpi eq, %231, %254 : vector<2x4xi32>
    %cst_108 = arith.constant 0.000000e+00 : f32
    %256 = vector.shape_cast %230 : vector<2x1xf32> to vector<2x1xf32>
    %257 = vector.broadcast %256 : vector<2x1xf32> to vector<2x4xf32>
    %258 = vector.broadcast %cst_108 : f32 to vector<2x4xf32>
    %259 = arith.select %255, %257, %258 : vector<2x4xi1>, vector<2x4xf32>
    %260 = arith.addf %253, %259 : vector<2x4xf32>
    %c0_109 = arith.constant 0 : index
    %c0_110 = arith.constant 0 : index
    %261 = vector.load %arg13[%c0_109, %c0_110] : memref<2x4xf32, #tpu.memory_space<vmem>>, vector<2x4xf32>
    tpu.vector_store %arg13[%c0_109, %c0_110], %260 {strides = array<i32>} : memref<2x4xf32, #tpu.memory_space<vmem>>, vector<2x4xf32>,
    return
  }
}

</mosaic_0001>

<bundles_post_ra>
// kernel: tpu_custom_call.1
= control target key start
LH: loop header
LB: loop body
LE: loop exit
PB: predicated region body
PF: predicated region fallthrough
CT: control target
= control target key end

     0   :  { %18 = vsyncpa [#allocation3], 0  ;;  %s3528_s0 = inlined_call_operand.hbm [shape: f32[2,8,32], index: 0, kind: input, shape index: {}]   ;;  %s3529_s1 = inlined_call_operand.vmem [shape: f32[3,32,32], index: 1, kind: input, shape index: {}]   ;;  %s3530_s2 = inlined_call_operand.hbm [shape: f32[3,1,32], index: 2, kind: input, shape index: {}]   ;;  %s3531_s3 = inlined_call_operand.hbm [shape: f32[3,32,32], index: 3, kind: input, shape index: {}]   ;;  %s3532_s4 = inlined_call_operand.vmem [shape: f32[3,16,64], index: 4, kind: input, shape index: {}]   ;;  %s3533_s5 = inlined_call_operand.vmem [shape: f32[2,32,16], index: 5, kind: input, shape index: {}]   ;;  %s3534_s6 = inlined_call_operand.hbm [shape: f32[3,2,16], index: 6, kind: input, shape index: {}]   ;;  %s3535_s7 = inlined_call_operand.hbm [shape: f32[16,32], index: 7, kind: input, shape index: {}]   ;;  %s3536_s8 = inlined_call_operand.vmem [shape: f32[14,32], index: 8, kind: input, shape index: {}]   ;;  %s3537_s9 = inlined_call_operand.hbm [shape: f32[32,32], index: 9, kind: input, shape index: {}]   ;;  %s3538_s10 = inlined_call_operand.vmem [shape: s32[14,1], index: 10, kind: input, shape index: {}]   ;;  %s3539_s11 = inlined_call_operand.vmem [shape: f32[14,2], index: 11, kind: input, shape index: {}]   ;;  %s3540_s12 = inlined_call_operand.vmem [shape: f32[2,14], index: 12, kind: input, shape index: {}]   ;;  %s3541_s13 = inlined_call_operand.hbm [shape: f32[2,4], index: 13, kind: output, shape index: {}]  }
   0x1   :  { %19 = vsyncpa [#allocation6], 0 }
   0x2   :  { %20 = vsyncpa [#allocation9], 0 }
   0x3   :  { %21 = vsyncpa [#allocation12], 0 }
   0x4   :  { %22 = vsyncpa [#allocation4], 0  ;;  %s2993_s25 = smov [#allocation5]   ;;  %s2829_s29 = scalar_lea.hbm %s3530_s2, 48 }
   0x5   :  { %s42_s26 = sshll.u32 %s2993_s25, 4  ;;  %p2830_p0 = scmp.ne.s32.totalorder %s3530_s2, %s2829_s29  ;;  %s43_s26 = int_to_ptr.vmem [resolvable:$true] %s42_s26 }
   0x6   :  { %p2833_p1 = scmp.lt.u32.totalorder %s2829_s29, %s3530_s2 }
   0x8   :  { %p2835_p2 = pnand %p2833_p1, %p2830_p0 }
   0xa   :  { %2838 = shalt.err (!%p2835_p2)
}
   0xb   :  { %s2839_s17 = scalar_lea.vmem %s43_s26, 48  ;;  %s2843_s18 = scalar_lea.vmem %s43_s26, 64 }
   0xc   :  { %p2840_p3 = scmp.ne.s32.totalorder %s43_s26, %s2839_s17  ;;  %p2844_p4 = scmp.lt.s32.totalorder %s43_s26, %s43_s26 }
   0xd   :  { %p2845_p5 = scmp.lt.s32.totalorder %s2843_s18, %s2839_s17 }
   0xf   :  { %p2846_p6 = por %p2845_p5, %p2844_p4 }
  0x11   :  { %p2847_p7 = pnand %p2846_p6, %p2840_p3 }
  0x13   :  { %2850 = shalt.err (!%p2847_p7)
}
  0x14   :  { %s2994_s19 = smov 16   ;;  %s2995_s20 = smov 1  }
  0x15   :  { %48 = dma.hbm_to_vmem [thread:$0]  %s3530_s2, 48, %s43_s26, [#allocation6], %s2994_s19, %s2994_s19, %s2995_s20  }
  0x16   :  { %s2996_s23 = smov [#allocation8]   ;;  %s2851_s28 = scalar_lea.hbm %s3534_s6, 96 }
  0x17   :  { %s70_s24 = sshll.u32 %s2996_s23, 4  ;;  %p2852_p8 = scmp.ne.s32.totalorder %s3534_s6, %s2851_s28  ;;  %s71_s24 = int_to_ptr.vmem [resolvable:$true] %s70_s24 }
  0x18   :  { %p2855_p9 = scmp.lt.u32.totalorder %s2851_s28, %s3534_s6 }
  0x1a   :  { %p2857_p10 = pnand %p2855_p9, %p2852_p8 }
  0x1c   :  { %2860 = shalt.err (!%p2857_p10)
}
  0x1d   :  { %s2861_s16 = scalar_lea.vmem %s71_s24, 96  ;;  %p2866_p12 = scmp.lt.s32.totalorder %s71_s24, %s71_s24 }
  0x1e   :  { %p2862_p11 = scmp.ne.s32.totalorder %s71_s24, %s2861_s16  ;;  %p2867_p13 = scmp.lt.s32.totalorder %s2861_s16, %s2861_s16 }
  0x20   :  { %p2868_p0 = por %p2867_p13, %p2866_p12 }
  0x22   :  { %p2869_p1 = pnand %p2868_p0, %p2862_p11 }
  0x24   :  { %2872 = shalt.err (!%p2869_p1)
}
  0x25   :  { %s2997_s2 = smov 32   ;;  %s2998_s26 = smov 2  }
  0x26   :  { %76 = dma.hbm_to_vmem [thread:$0]  %s3534_s6, 96, %s71_s24, [#allocation9], %s2997_s2, %s2997_s2, %s2998_s26  }
  0x27   :  { %s2999_s20 = smov [#allocation2]   ;;  %s2873_s25 = scalar_lea.hbm %s3528_s0, 256 }
  0x28   :  { %s28_s21 = sshll.u32 %s2999_s20, 4  ;;  %p2874_p2 = scmp.ne.s32.totalorder %s3528_s0, %s2873_s25  ;;  %s29_s21 = int_to_ptr.vmem [resolvable:$true] %s28_s21 }
  0x29   :  { %p2877_p3 = scmp.lt.u32.totalorder %s2873_s25, %s3528_s0 }
  0x2b   :  { %p2879_p4 = pnand %p2877_p3, %p2874_p2 }
  0x2d   :  { %2882 = shalt.err (!%p2879_p4)
}
  0x2e   :  { %s2883_s14 = scalar_lea.vmem %s29_s21, 256  ;;  %p2888_p6 = scmp.lt.s32.totalorder %s29_s21, %s29_s21 }
  0x2f   :  { %p2884_p5 = scmp.ne.s32.totalorder %s29_s21, %s2883_s14  ;;  %p2889_p7 = scmp.lt.s32.totalorder %s2883_s14, %s2883_s14 }
  0x31   :  { %p2890_p8 = por %p2889_p7, %p2888_p6 }
  0x33   :  { %p2891_p9 = pnand %p2890_p8, %p2884_p5 }
  0x35   :  { %2894 = shalt.err (!%p2891_p9)
}
  0x36   :  { %s3000_s6 = smov 128   ;;  %s3001_s24 = smov 8  }
  0x37   :  { %34 = dma.hbm_to_vmem [thread:$0]  %s3528_s0, 256, %s29_s21, [#allocation3], %s3000_s6, %s3000_s6, %s3001_s24  }
  0x38   :  { %s3002_s26 = smov [#allocation7]   ;;  %s3003_s18 = smov [#allocation10]  }
  0x39   :  { %s54_s17 = sshll.u32 %s3002_s26, 4  ;;  %s82_s20 = sshll.u32 %s3003_s18, 4  ;;  %s55_s17 = int_to_ptr.vmem [resolvable:$true] %s54_s17  ;;  %s83_s20 = int_to_ptr.vmem [resolvable:$true] %s82_s20 }
  0x3a   :  { %s2895_s25 = scalar_lea.hbm %s3531_s3, 1536 }
  0x3b   :  { %p2896_p10 = scmp.ne.s32.totalorder %s3531_s3, %s2895_s25  ;;  %p2899_p11 = scmp.lt.u32.totalorder %s2895_s25, %s3531_s3 }
  0x3d   :  { %p2901_p12 = pnand %p2899_p11, %p2896_p10 }
  0x3f   :  { %2904 = shalt.err (!%p2901_p12)
}
  0x40   :  { %s2905_s0 = scalar_lea.vmem %s55_s17, 1536  ;;  %p2910_p0 = scmp.lt.s32.totalorder %s55_s17, %s55_s17 }
  0x41   :  { %p2906_p13 = scmp.ne.s32.totalorder %s55_s17, %s2905_s0  ;;  %p2911_p1 = scmp.lt.s32.totalorder %s2905_s0, %s2905_s0 }
  0x43   :  { %p2912_p2 = por %p2911_p1, %p2910_p0 }
  0x45   :  { %p2913_p3 = pnand %p2912_p2, %p2906_p13 }
  0x47   :  { %2916 = shalt.err (!%p2913_p3)
}
  0x48   :  { %60 = dma.hbm_to_vmem [thread:$0]  %s3531_s3, 1536, %s55_s17, [#allocation6], %s3000_s6, %s3000_s6, %s3001_s24  }
  0x49   :  { %s2917_s26 = scalar_lea.hbm %s3535_s7, 256 }
  0x4a   :  { %p2918_p4 = scmp.ne.s32.totalorder %s3535_s7, %s2917_s26  ;;  %p2921_p5 = scmp.lt.u32.totalorder %s2917_s26, %s3535_s7 }
  0x4c   :  { %p2923_p6 = pnand %p2921_p5, %p2918_p4 }
  0x4e   :  { %2926 = shalt.err (!%p2923_p6)
}
  0x4f   :  { %s2927_s27 = scalar_lea.vmem %s83_s20, 256  ;;  %p2932_p8 = scmp.lt.s32.totalorder %s83_s20, %s83_s20 }
  0x50   :  { %p2928_p7 = scmp.ne.s32.totalorder %s83_s20, %s2927_s27  ;;  %p2933_p9 = scmp.lt.s32.totalorder %s2927_s27, %s2927_s27 }
  0x52   :  { %p2934_p10 = por %p2933_p9, %p2932_p8 }
  0x54   :  { %p2935_p11 = pnand %p2934_p10, %p2928_p7 }
  0x56   :  { %2938 = shalt.err (!%p2935_p11)
}
  0x57   :  { %88 = dma.hbm_to_vmem [thread:$0]  %s3535_s7, 256, %s83_s20, [#allocation9], %s3000_s6, %s3000_s6, %s3001_s24  }
  0x58   :  { %s3004_s28 = smov [#allocation11]   ;;  %s2939_s21 = scalar_lea.hbm %s3537_s9, 512 }
  0x59   :  { %s96_s29 = sshll.u32 %s3004_s28, 4  ;;  %p2940_p12 = scmp.ne.s32.totalorder %s3537_s9, %s2939_s21  ;;  %s97_s29 = int_to_ptr.vmem [resolvable:$true] %s96_s29 }
  0x5a   :  { %p2943_p13 = scmp.lt.u32.totalorder %s2939_s21, %s3537_s9 }
  0x5c   :  { %p2945_p0 = pnand %p2943_p13, %p2940_p12 }
  0x5e   :  { %2948 = shalt.err (!%p2945_p0)
}
  0x5f   :  { %s2949_s18 = scalar_lea.vmem %s97_s29, 512  ;;  %p2954_p2 = scmp.lt.s32.totalorder %s97_s29, %s97_s29 }
  0x60   :  { %p2950_p1 = scmp.ne.s32.totalorder %s97_s29, %s2949_s18  ;;  %p2955_p3 = scmp.lt.s32.totalorder %s2949_s18, %s2949_s18 }
  0x62   :  { %p2956_p4 = por %p2955_p3, %p2954_p2 }
  0x64   :  { %p2957_p5 = pnand %p2956_p4, %p2950_p1 }
  0x66   :  { %2960 = shalt.err (!%p2957_p5)
}
  0x67   :  { %102 = dma.hbm_to_vmem [thread:$0]  %s3537_s9, 512, %s97_s29, [#allocation12], %s3000_s6, %s3000_s6, %s3001_s24  }
  0x68   :  { %2983 = dma.done.wait [#allocation3], 256  }
  0x69   :  { %2984 = vsyncadd [#allocation3], 4294967040 }
  0x6a   :  { %2985 = dma.done.wait [#allocation6], 1584  }
  0x6b   :  { %2986 = vsyncadd [#allocation6], 4294965712 }
  0x6c   :  { %2987 = dma.done.wait [#allocation9], 352  }
  0x6d   :  { %2988 = vsyncadd [#allocation9], 4294966944 }
  0x6e   :  { %2989 = dma.done.wait [#allocation12], 512  }
  0x6f   :  { %2990 = vsyncadd [#allocation12], 4294966784  ;;  %vm133_vm0 = vcmask 261120   ;;  %v129_v0 = vld [vmem:[%s3529_s1] sm:$0xff]  ;;  %v130_v1 = vld [vmem:[%s3529_s1 + $0x8] sm:$0xff]  ;;  %v3005_v8 = vmov 0.0   ;;  %v236_v20 = vlaneseq }
  0x70   :  { %v131_v2 = vld [vmem:[%s3529_s1 + $0x10] sm:$0xff]  ;;  %v2650_v3 = vpack.c.bf16 %v130_v1, %v129_v0  ;;  %v132_v4 = vld [vmem:[%s3529_s1 + $0x18] sm:$0xff]  ;;  %v127_v5 = vld [vmem:[#allocation2] sm:$0xff]  ;;  %2492 = vmatprep.subr.mxu1 %v3005_v8  ;;  %vm246_vm1 = vcmask 1041409   ;;  %vm249_vm2 = vcmask 58368   ;;  %v3006_v30 = vmov 0  }
  0x71   :  { %v2654_v6 = vpack.c.bf16 %v132_v4, %v131_v2  ;;  %2489 = vmatprep.mubr.msk.f32.mxu0 %vm133_vm0, %v127_v5  ;;  %v128_v7 = vld [vmem:[#allocation2 + $0x8] sm:$0xff]  ;;  %v2353_v11 = vld [vmem:[#allocation5] ss:$0 sm:$0xff]  ;;  %v3198_v21 = vand.u32 127, %v236_v20  ;;  %v239_v22 = vshrl.u32 %v236_v20, 7  ;;  %2750 = vset.pattern.permute.xlu0 %v3006_v30  ;;  %vm3007_vm3 = vmmov 0  }
  0x72   :  { %2651 = vmatprep.subr.bf16.mxu0 %v2650_v3  ;;  %2749 = vset.pattern.permute.xlu1 %v3006_v30  ;;  %v2356_v55 = vld [vmem:[%s3529_s1 + $0x20] sm:$0xff]  ;;  %v2357_v56 = vld [vmem:[%s3529_s1 + $0x28] sm:$0xff]  ;;  %vm314_vm4 = vcmask 64512   ;;  %v2358_v60 = vld [vmem:[%s3529_s1 + $0x30] sm:$0xff]  ;;  %s3009_s9 = smov 112   ;;  %vm1377_vm5 = vcmask 130048  }
  0x73   :  { %2653 = vmatpush3.bf16.msra.mxu0 %v2650_v3  ;;  %v3201_v23 = vsub.s32 %v3198_v21, %v239_v22  ;;  %v3207_v31 = vsub.s32 0, %v239_v22  ;;  %v3209_v32 = vsub.s32 1, %v239_v22  ;;  %2494 = vmatprep.mubr.msk.f32.mxu1 %vm3007_vm3, %v3005_v8  ;;  %v2658_v59 = vpack.c.bf16 %v2357_v56, %v2356_v55  ;;  %v2359_v61 = vld [vmem:[%s3529_s1 + $0x38] sm:$0xff]  ;;  %v2365_v1 = vld [vmem:[%s3529_s1 + $0x40] sm:$0xff]  ;;  %v2366_v2 = vld [vmem:[%s3529_s1 + $0x48] sm:$0xff] }
  0x74   :  { %2655 = vmatprep.subr.bf16.mxu0 %v2654_v6  ;;  %v2662_v0 = vpack.c.bf16 %v2359_v61, %v2358_v60  ;;  %v2367_v3 = vld [vmem:[%s3529_s1 + $0x50] sm:$0xff]  ;;  %v2666_v4 = vpack.c.bf16 %v2366_v2, %v2365_v1  ;;  %v2368_v5 = vld [vmem:[%s3529_s1 + $0x58] sm:$0xff]  ;;  %vm2007_vm6 = vcmask 15360   ;;  %vm2014_vm7 = vcmask 1041408  }
  0x75   :  { %vm2185_vm8 = vcmask 259072   ;;  %vm2240_vm13 = vcmask 1045504   ;;  %vm3011_vm14 = vmmov 1  }
  0x76   :  { %vm2726_vm15 = vmpackc.low %vm2240_vm13, %vm3011_vm14 }
  0x77   :  { %2657 = vmatpush3.bf16.msra.mxu0 %v2654_v6  ;;  %v2670_v6 = vpack.c.bf16 %v2368_v5, %v2367_v3 }
  0x78   :  { %2513 = vmatprep.subr.mxu0 %v3005_v8 }
  0x7a   :  { %2490 = vmatmul.mubr.msk.f32.vlgmr.msra.gmra.mrb[0].mxu0 %vm133_vm0, %v128_v7  ;;  %v3008_v7 = vmov 0.0|0.0  }
  0x7b   :  { %2515 = vmatprep.mubr.msk.f32.mxu0 %vm3007_vm3, %v3005_v8 }
 0x14d   :  { %v2491_v9 = vpop.f32.mrb[0].mxu0 }
 0x14e   :  { %2751 = vtanh.f32 %v2491_v9  ;;  %v206_v10 = vpop.f32.mrb[1].mxu0 }
 0x14f   :  { %2753 = vtanh.f32 %v206_v10 }
 0x158   :  { %v3188_v12 = vpop.eup %2751 }
 0x159   :  { %v3190_v13 = vpop.eup %2753  ;;  %v225_v16 = vmul.f32 %v3188_v12, %v2353_v11 }
 0x15a   :  { %2493 = vmatpush3.msra.mxu1 %v3190_v13  ;;  %v224_v14 = vmul.f32 %v3190_v13, %v2353_v11 }
 0x15b   :  { %2497 = vmatprep.subr.mxu1 %v3005_v8  ;;  %v229_v17 = vsel %vm133_vm0, %v225_v16, 0.0 }
 0x15c   :  { %v226_v15 = vsel %vm133_vm0, %v224_v14, 0.0 }
 0x15d   :  { %227 = vadd.xlane.f32.xlu0 %v226_v15 }
 0x161   :  { %230 = vadd.xlane.f32.xlu0 %v229_v17  ;;  %v1135_v17 = vld [vmem:[#allocation7] sm:$0xff] }
 0x1ea   :  { %v228_v18 = vpop.xlane.xlu0 %227 }
 0x1eb   :  { %2755 = vtanh.f32 %v228_v18  ;;  %v1136_v18 = vld [vmem:[#allocation7 + $0x8] sm:$0xff] }
 0x1ec   :  { %v2675_v22 = vpack.c.bf16 %v1136_v18, %v1135_v17 }
 0x1ee   :  { %v231_v19 = vpop.xlane.xlu0 %230 }
 0x1ef   :  { %2757 = vtanh.f32 %v231_v19  ;;  %v2362_v19 = vld [vmem:[#allocation5 + $0x1] ss:$0 sm:$0xff] }
 0x1f5   :  { %v2756_v24 = vpop.eup %2755 }
 0x1f6   :  { %v241_v26 = vrot.slane %v2756_v24, %v3201_v23 }
 0x1f9   :  { %v2758_v25 = vpop.eup %2757 }
 0x1fa   :  { %v245_v27 = vrot.slane %v2758_v25, %v3201_v23 }
 0x1fc   :  { %v247_v28 = vsel %vm246_vm1, %v245_v27, %v241_v26  ;;  %v1137_v26 = vld [vmem:[#allocation7 + $0x10] sm:$0xff]  ;;  %v1138_v27 = vld [vmem:[#allocation7 + $0x18] sm:$0xff] }
 0x1fd   :  { %v250_v29 = vsel %vm249_vm2, %v247_v28, -inf }
 0x1fe   :  { %251 = vmax.xlane.f32.xlu1 %v250_v29 }
 0x28b   :  { %v252_v33 = vpop.xlane.xlu1 %251 }
 0x28c   :  { %v257_v34 = vrot.slane %v252_v33, %v3207_v31  ;;  %v261_v35 = vrot.slane %v252_v33, %v3209_v32  ;;  %v2678_v33 = vpack.c.bf16 %v1138_v27, %v1137_v26 }
 0x28e   :  { %v264_v36 = vsub.f32 %v2756_v24, %v257_v34  ;;  %v265_v37 = vsub.f32 %v2758_v25, %v261_v35 }
 0x290   :  { %v266_v38 = vmul.f32 1.442695, %v264_v36  ;;  %v268_v39 = vmul.f32 1.442695, %v265_v37 }
 0x292   :  { %2759 = vpow2.f32 %v266_v38 }
 0x293   :  { %2761 = vpow2.f32 %v268_v39 }
 0x29c   :  { %v2760_v40 = vpop.eup %2759 }
 0x29d   :  { %v2762_v41 = vpop.eup %2761  ;;  %273 = vperm.xlu1 %2749, %v2760_v40  }
 0x29e   :  { %276 = vperm.xlu0 %2750, %v2762_v41  }
 0x31c   :  { %v274_v42 = vpop.permute.xlu1 %273 }
 0x31d   :  { %v277_v43 = vpop.permute.xlu0 %276  ;;  %v281_v44 = vrot.slane %v274_v42, %v3201_v23 }
 0x31e   :  { %v285_v45 = vrot.slane %v277_v43, %v3201_v23 }
 0x320   :  { %v286_v46 = vsel %vm246_vm1, %v285_v45, %v281_v44 }
 0x321   :  { %v288_v47 = vsel %vm249_vm2, %v286_v46, 0.0  ;;  %v2371_v46 = vld [vmem:[#allocation5 + $0x2] ss:$0 sm:$0xff] }
 0x322   :  { %289 = vadd.xlane.f32.xlu1 %v288_v47 }
 0x3af   :  { %v290_v48 = vpop.xlane.xlu1 %289 }
 0x3b0   :  { %v295_v49 = vrot.slane %v290_v48, %v3207_v31  ;;  %v299_v50 = vrot.slane %v290_v48, %v3209_v32 }
 0x3b2   :  { %2763 = vrcp.f32 %v295_v49 }
 0x3b3   :  { %2765 = vrcp.f32 %v299_v50 }
 0x3bc   :  { %v2764_v51 = vpop.eup %2763 }
 0x3bd   :  { %v303_v52 = vmul.f32 %v2764_v51, %v2760_v40  ;;  %v2766_v53 = vpop.eup %2765 }
 0x3be   :  { %v305_v54 = vmul.f32 %v2766_v53, %v2762_v41 }
 0x3bf   :  { %308 = vperm.xlu0 %2750, %v303_v52  }
 0x3c3   :  { %389 = vperm.xlu0 %2750, %v305_v54  }
 0x43e   :  { %v309_v57 = vpop.permute.xlu0 %308 }
 0x43f   :  { %v313_v58 = vrot.slane %v309_v57, %v3201_v23 }
 0x441   :  { %2495 = vmatmul.mubr.msk.f32.vlgmr.msra.gmra.mrb[0].mxu1 %vm314_vm4, %v313_v58 }
 0x442   :  { %2498 = vmatpush3.msra.mxu1 %v3188_v12  ;;  %v390_v62 = vpop.permute.xlu0 %389  ;;  %2499 = vmatprep.mubr.msk.f32.mxu1 %vm3007_vm3, %v3005_v8 }
 0x443   :  { %v394_v63 = vrot.slane %v390_v62, %v3201_v23  ;;  %2659 = vmatprep.subr.bf16.mxu1 %v2658_v59 }
 0x445   :  { %2500 = vmatmul.mubr.msk.f32.vlgmr.msra.gmra.mrb[2].mxu1 %vm314_vm4, %v394_v63 }
 0x446   :  { %2661 = vmatpush3.bf16.msra.mxu1 %v2658_v59  ;;  %2510 = vmatprep.mubr.msk.f32.mxu1 %vm133_vm0, %v3190_v13 }
 0x447   :  { %2663 = vmatprep.subr.bf16.mxu1 %v2662_v0 }
 0x44a   :  { %2665 = vmatpush3.bf16.msra.mxu1 %v2662_v0 }
 0x44b   :  { %2667 = vmatprep.subr.bf16.mxu1 %v2666_v4 }
 0x44d   :  { %2511 = vmatmul.mubr.msk.f32.vlgmr.msra.gmra.mrb[4].mxu1 %vm133_vm0, %v3188_v12 }
 0x44e   :  { %2669 = vmatpush3.bf16.msra.mxu1 %v2666_v4 }
 0x44f   :  { %2671 = vmatprep.subr.bf16.mxu1 %v2670_v6 }
 0x452   :  { %2673 = vmatpush3.bf16.msra.mxu1 %v2670_v6 }
 0x453   :  { %2674 = vmatprep.subr.bf16.mxu1 %v3008_v7 }
 0x514   :  { %v383_v9 = vpop.f32.mrb[0].mxu1 }
 0x515   :  { %v2496_v10 = vpop.f32.mrb[1].mxu1 }
 0x518   :  { %v463_v11 = vpop.f32.mrb[2].mxu1 }
 0x519   :  { %v1149_v12 = vrot.slane %v463_v11, 7  ;;  %v2501_v13 = vpop.f32.mrb[3].mxu1 }
 0x51b   :  { %v1150_v14 = vsel %vm246_vm1, %v1149_v12, %v383_v9 }
 0x520   :  { %v2512_v15 = vpop.f32.mrb[4].mxu1 }
 0x521   :  { %2767 = vtanh.f32 %v2512_v15  ;;  %v544_v16 = vpop.f32.mrb[5].mxu1 }
 0x522   :  { %2769 = vtanh.f32 %v544_v16 }
 0x52b   :  { %v3260_v20 = vpop.eup %2767 }
 0x52c   :  { %v2770_v24 = vpop.eup %2769  ;;  %v564_v25 = vmul.f32 %v3260_v20, %v2362_v19 }
 0x52d   :  { %2514 = vmatpush3.msra.mxu0 %v2770_v24  ;;  %2531 = vmatprep.mubr.msk.f32.mxu1 %vm133_vm0, %v2770_v24  ;;  %v563_v28 = vmul.f32 %v2770_v24, %v2362_v19 }
 0x52e   :  { %2532 = vmatmul.mubr.msk.f32.vlgmr.msra.gmra.mrb[6].mxu1 %vm133_vm0, %v3260_v20  ;;  %v568_v29 = vsel %vm133_vm0, %v564_v25, 0.0  ;;  %2518 = vmatprep.subr.mxu0 %v3005_v8 }
 0x52f   :  { %2676 = vmatpush3.bf16.msra.mxu1 %v2675_v22  ;;  %569 = vadd.xlane.f32.xlu0 %v568_v29  ;;  %v565_v30 = vsel %vm133_vm0, %v563_v28, 0.0 }
 0x530   :  { %566 = vadd.xlane.f32.xlu1 %v565_v30  ;;  %2677 = vmatprep.subr.bf16.mxu1 %v3008_v7 }
 0x531   :  { %2552 = vmatprep.mubr.msk.f32.mxu1 %vm3007_vm3, %v3005_v8 }
 0x533   :  { %2679 = vmatpush3.bf16.msra.mxu1 %v2678_v33 }
 0x534   :  { %2686 = vmatprep.subr.bf16.mxu1 %v3008_v7 }
 0x536   :  { %2553 = vmatmul.mubr.msk.f32.vlgmr.msra.gmra.mrb[8].mxu1 %vm133_vm0, %v1150_v14 }
 0x537   :  { %2574 = vmatprep.mubr.msk.f32.mxu1 %vm3007_vm3, %v3005_v8 }
 0x5bc   :  { %v570_v34 = vpop.xlane.xlu0 %569 }
 0x5bd   :  { %2771 = vtanh.f32 %v570_v34  ;;  %v567_v35 = vpop.xlane.xlu1 %566 }
 0x5be   :  { %2773 = vtanh.f32 %v567_v35 }
 0x5c7   :  { %v2772_v36 = vpop.eup %2771 }
 0x5c8   :  { %v2774_v37 = vpop.eup %2773  ;;  %v582_v38 = vrot.slane %v2772_v36, %v3201_v23 }
 0x5c9   :  { %v578_v39 = vrot.slane %v2774_v37, %v3201_v23 }
 0x5cb   :  { %v583_v40 = vsel %vm246_vm1, %v582_v38, %v578_v39 }
 0x5cc   :  { %v585_v41 = vsel %vm249_vm2, %v583_v40, -inf }
 0x5cd   :  { %586 = vmax.xlane.f32.xlu1 %v585_v41 }
 0x601   :  { %v2533_v42 = vpop.f32.mrb[6].mxu1 }
 0x602   :  { %2775 = vtanh.f32 %v2533_v42  ;;  %v878_v43 = vpop.f32.mrb[7].mxu1 }
 0x609   :  { %v3280_v44 = vpop.f32.mrb[8].mxu1 }
 0x60a   :  { %v2554_v45 = vpop.f32.mrb[9].mxu1 }
 0x60c   :  { %v3282_v47 = vpop.eup %2775 }
 0x60d   :  { %v898_v48 = vmul.f32 %v3282_v47, %v2371_v46 }
 0x60f   :  { %v902_v49 = vsel %vm133_vm0, %v898_v48, 0.0 }
 0x610   :  { %903 = vadd.xlane.f32.xlu0 %v902_v49 }
 0x65a   :  { %v587_v50 = vpop.xlane.xlu1 %586 }
 0x65b   :  { %v592_v51 = vrot.slane %v587_v50, %v3207_v31  ;;  %v596_v52 = vrot.slane %v587_v50, %v3209_v32 }
 0x65d   :  { %v599_v53 = vsub.f32 %v2774_v37, %v592_v51  ;;  %v600_v54 = vsub.f32 %v2772_v36, %v596_v52 }
 0x65f   :  { %v601_v55 = vmul.f32 1.442695, %v599_v53  ;;  %v603_v56 = vmul.f32 1.442695, %v600_v54 }
 0x661   :  { %2777 = vpow2.f32 %v601_v55 }
 0x662   :  { %2779 = vpow2.f32 %v603_v56 }
 0x663   :  { %2781 = vtanh.f32 %v878_v43 }
 0x66b   :  { %v2778_v57 = vpop.eup %2777 }
 0x66c   :  { %608 = vperm.xlu1 %2749, %v2778_v57   ;;  %v2780_v58 = vpop.eup %2779 }
 0x66d   :  { %v2782_v59 = vpop.eup %2781 }
 0x66e   :  { %v897_v60 = vmul.f32 %v2782_v59, %v2371_v46 }
 0x670   :  { %611 = vperm.xlu1 %2749, %v2780_v58   ;;  %v899_v61 = vsel %vm133_vm0, %v897_v60, 0.0  ;;  %v1139_v60 = vld [vmem:[#allocation7 + $0x20] sm:$0xff] }
 0x694   :  { %900 = vadd.xlane.f32.xlu1 %v899_v61 }
 0x69d   :  { %v904_v4 = vpop.xlane.xlu0 %903 }
 0x69e   :  { %2783 = vtanh.f32 %v904_v4  ;;  %v1143_v4 = vld [vmem:[#allocation7 + $0x40] sm:$0xff] }
 0x6a8   :  { %v2784_v6 = vpop.eup %2783 }
 0x6a9   :  { %v916_v11 = vrot.slane %v2784_v6, %v3201_v23 }
 0x6eb   :  { %v609_v62 = vpop.permute.xlu1 %608 }
 0x6ec   :  { %v616_v0 = vrot.slane %v609_v62, %v3201_v23 }
 0x6ef   :  { %v612_v63 = vpop.permute.xlu1 %611 }
 0x6f0   :  { %v620_v1 = vrot.slane %v612_v63, %v3201_v23 }
 0x6f2   :  { %v621_v2 = vsel %vm246_vm1, %v620_v1, %v616_v0  ;;  %v1141_v0 = vld [vmem:[#allocation7 + $0x30] sm:$0xff]  ;;  %v1142_v1 = vld [vmem:[#allocation7 + $0x38] sm:$0xff] }
 0x6f3   :  { %v623_v3 = vsel %vm249_vm2, %v621_v2, 0.0  ;;  %v2684_v2 = vpack.c.bf16 %v1142_v1, %v1141_v0 }
 0x6f4   :  { %624 = vadd.xlane.f32.xlu0 %v623_v3 }
 0x721   :  { %v901_v5 = vpop.xlane.xlu1 %900 }
 0x722   :  { %2785 = vtanh.f32 %v901_v5  ;;  %v1144_v5 = vld [vmem:[#allocation7 + $0x48] sm:$0xff] }
 0x72c   :  { %v2786_v9 = vpop.eup %2785 }
 0x72d   :  { %v912_v10 = vrot.slane %v2786_v9, %v3201_v23 }
 0x72f   :  { %v917_v12 = vsel %vm246_vm1, %v916_v11, %v912_v10  ;;  %v1146_v10 = vld [vmem:[#allocation7 + $0x58] sm:$0xff] }
 0x730   :  { %v919_v13 = vsel %vm249_vm2, %v917_v12, -inf }
 0x731   :  { %920 = vmax.xlane.f32.xlu0 %v919_v13 }
 0x781   :  { %v625_v14 = vpop.xlane.xlu0 %624 }
 0x782   :  { %v630_v15 = vrot.slane %v625_v14, %v3207_v31  ;;  %v634_v16 = vrot.slane %v625_v14, %v3209_v32 }
 0x784   :  { %2787 = vrcp.f32 %v630_v15 }
 0x785   :  { %2789 = vrcp.f32 %v634_v16 }
 0x78e   :  { %v2788_v17 = vpop.eup %2787 }
 0x78f   :  { %v2790_v18 = vpop.eup %2789  ;;  %v638_v19 = vmul.f32 %v2788_v17, %v2778_v57 }
 0x790   :  { %v640_v22 = vmul.f32 %v2790_v18, %v2780_v58 }
 0x791   :  { %643 = vperm.xlu0 %2750, %v638_v19  }
 0x792   :  { %723 = vperm.xlu1 %2749, %v640_v22  }
 0x7be   :  { %v921_v24 = vpop.xlane.xlu0 %920 }
 0x7bf   :  { %v926_v25 = vrot.slane %v921_v24, %v3207_v31  ;;  %v930_v26 = vrot.slane %v921_v24, %v3209_v32 }
 0x7c1   :  { %v933_v27 = vsub.f32 %v2786_v9, %v926_v25  ;;  %v934_v28 = vsub.f32 %v2784_v6, %v930_v26  ;;  %v2687_v6 = vpack.c.bf16 %v1144_v5, %v1143_v4  ;;  %v1145_v9 = vld [vmem:[#allocation7 + $0x50] sm:$0xff] }
 0x7c2   :  { %v2690_v11 = vpack.c.bf16 %v1146_v10, %v1145_v9 }
 0x7c3   :  { %v935_v29 = vmul.f32 1.442695, %v933_v27  ;;  %v937_v30 = vmul.f32 1.442695, %v934_v28  ;;  %2688 = vmatpush3.bf16.msra.mxu1 %v2687_v6 }
 0x7c4   :  { %2689 = vmatprep.subr.bf16.mxu1 %v3008_v7 }
 0x7c5   :  { %2791 = vpow2.f32 %v935_v29  ;;  %v1509_v29 = vld [vmem:[%s3533_s5] sm:$0xff] }
 0x7c6   :  { %2793 = vpow2.f32 %v937_v30  ;;  %v1510_v30 = vld [vmem:[%s3533_s5 + $0x8] sm:$0xff] }
 0x7c7   :  { %2691 = vmatpush3.bf16.msra.mxu1 %v2690_v11 }
 0x7c8   :  { %2701 = vmatprep.subr.bf16.mxu1 %v3008_v7 }
 0x7cf   :  { %v2792_v33 = vpop.eup %2791 }
 0x7d0   :  { %942 = vperm.xlu0 %2750, %v2792_v33   ;;  %v2794_v34 = vpop.eup %2793 }
 0x7d4   :  { %945 = vperm.xlu0 %2750, %v2794_v34  }
 0x810   :  { %v644_v35 = vpop.permute.xlu0 %643 }
 0x811   :  { %v648_v36 = vrot.slane %v644_v35, %v3201_v23  ;;  %v724_v37 = vpop.permute.xlu1 %723 }
 0x812   :  { %v728_v38 = vrot.slane %v724_v37, %v3201_v23 }
 0x813   :  { %2516 = vmatmul.mubr.msk.f32.vlgmr.msra.gmra.mrb[2].mxu0 %vm314_vm4, %v648_v36  ;;  %v1452_v36 = vld [vmem:[#allocation8] sm:$0x3] }
 0x814   :  { %2519 = vmatpush3.msra.mxu0 %v3260_v20  ;;  %2520 = vmatprep.mubr.msk.f32.mxu0 %vm3007_vm3, %v3005_v8 }
 0x815   :  { %2534 = vmatprep.subr.mxu0 %v3005_v8 }
 0x817   :  { %2521 = vmatmul.mubr.msk.f32.vlgmr.msra.gmra.mrb[4].mxu0 %vm314_vm4, %v728_v38 }
 0x818   :  { %2535 = vmatpush3.msra.mxu0 %v2782_v59  ;;  %2536 = vmatprep.mubr.msk.f32.mxu0 %vm3007_vm3, %v3005_v8 }
 0x819   :  { %2539 = vmatprep.subr.mxu0 %v3005_v8 }
 0x84f   :  { %v943_v39 = vpop.permute.xlu0 %942 }
 0x850   :  { %v950_v41 = vrot.slane %v943_v39, %v3201_v23 }
 0x853   :  { %v946_v40 = vpop.permute.xlu0 %945 }
 0x854   :  { %v954_v20 = vrot.slane %v946_v40, %v3201_v23 }
 0x856   :  { %v955_v42 = vsel %vm246_vm1, %v954_v20, %v950_v41 }
 0x857   :  { %v957_v43 = vsel %vm249_vm2, %v955_v42, 0.0  ;;  %vm2314_vm2 = vcmp.eq.s32.totalorder %v3198_v21, 0 }
 0x858   :  { %958 = vadd.xlane.f32.xlu0 %v957_v43  ;;  %v2379_v43 = vld [vmem:[%s3532_s4 + $0x10] sm:$0xff] }
 0x8e5   :  { %v959_v45 = vpop.xlane.xlu0 %958 }
 0x8e6   :  { %v964_v46 = vrot.slane %v959_v45, %v3207_v31  ;;  %v968_v48 = vrot.slane %v959_v45, %v3209_v32  ;;  %v717_v49 = vpop.f32.mrb[2].mxu0  ;;  %v1140_v32 = vld [vmem:[#allocation7 + $0x28] sm:$0xff] }
 0x8e7   :  { %v2517_v50 = vpop.f32.mrb[3].mxu0  ;;  %v2681_v62 = vpack.c.bf16 %v1140_v32, %v1139_v60  ;;  %v2380_v45 = vld [vmem:[%s3532_s4 + $0x18] sm:$0xff] }
 0x8e8   :  { %2795 = vrcp.f32 %v964_v46  ;;  %v2702_v46 = vpack.c.bf16 %v2380_v45, %v2379_v43 }
 0x8e9   :  { %2797 = vrcp.f32 %v968_v48 }
 0x8ea   :  { %v797_v51 = vpop.f32.mrb[4].mxu0 }
 0x8eb   :  { %v1225_v52 = vrot.slane %v797_v51, 7  ;;  %v2522_v53 = vpop.f32.mrb[5].mxu0 }
 0x8ed   :  { %v1226_v54 = vsel %vm246_vm1, %v1225_v52, %v717_v49 }
 0x8f2   :  { %v2796_v55 = vpop.eup %2795 }
 0x8f3   :  { %v972_v56 = vmul.f32 %v2796_v55, %v2792_v33  ;;  %v2798_v57 = vpop.eup %2797  ;;  %v2696_v33 = vpack.c.bf16 %v1510_v30, %v1509_v29  ;;  %v2005_v30 = vld [vmem:[%s3539_s11] sm:$0xff] }
 0x8f4   :  { %v974_v58 = vmul.f32 %v2798_v57, %v2794_v34  ;;  %v1512_v34 = vld [vmem:[%s3533_s5 + $0x18] sm:$0xff]  ;;  %v2384_v57 = vld [vmem:[%s3533_s5 + $0x28] sm:$0xff] }
 0x8f5   :  { %977 = vperm.xlu1 %2749, %v972_v56   ;;  %v2383_v56 = vld [vmem:[%s3533_s5 + $0x20] sm:$0xff] }
 0x8f9   :  { %1057 = vperm.xlu1 %2749, %v974_v58   ;;  %v2385_v58 = vld [vmem:[%s3533_s5 + $0x30] sm:$0xff] }
 0x974   :  { %v978_v59 = vpop.permute.xlu1 %977 }
 0x975   :  { %v982_v31 = vrot.slane %v978_v59, %v3201_v23  ;;  %v2705_v59 = vpack.c.bf16 %v2384_v57, %v2383_v56 }
 0x977   :  { %2537 = vmatmul.mubr.msk.f32.vlgmr.msra.gmra.mrb[6].mxu0 %vm314_vm4, %v982_v31  ;;  %v2386_v31 = vld [vmem:[%s3533_s5 + $0x38] sm:$0xff] }
 0x978   :  { %2540 = vmatpush3.msra.mxu0 %v3282_v47  ;;  %v1058_v61 = vpop.permute.xlu1 %1057  ;;  %2541 = vmatprep.mubr.msk.f32.mxu0 %vm3007_vm3, %v3005_v8  ;;  %v1375_v47 = vld [vmem:[%s3532_s4] sm:$0xff]  ;;  %v2708_v60 = vpack.c.bf16 %v2386_v31, %v2385_v58 }
 0x979   :  { %v1062_v63 = vrot.slane %v1058_v61, %v3201_v23  ;;  %2680 = vmatprep.subr.bf16.mxu0 %v3008_v7  ;;  %v1376_v23 = vld [vmem:[%s3532_s4 + $0x8] sm:$0xff]  ;;  %v1665_v61 = vld [vmem:[#allocation8 + $0x2] sm:$0x3] }
 0x97a   :  { %v2693_v3 = vpack.c.bf16 %v1376_v23, %v1375_v47  ;;  %v2388_v47 = vld [vmem:[%s3532_s4 + $0x20] sm:$0xff]  ;;  %v2389_v23 = vld [vmem:[%s3532_s4 + $0x28] sm:$0xff] }
 0x97b   :  { %2542 = vmatmul.mubr.msk.f32.vlgmr.msra.gmra.mrb[8].mxu0 %vm314_vm4, %v1062_v63  ;;  %vm2320_vm4 = vcmp.eq.s32.totalorder %v3198_v21, 2 }
 0x97c   :  { %2682 = vmatpush3.bf16.msra.mxu0 %v2681_v62  ;;  %2563 = vmatprep.mubr.msk.f32.mxu0 %vm3007_vm3, %v3005_v8 }
 0x97d   :  { %2683 = vmatprep.subr.bf16.mxu0 %v3008_v7 }
 0x980   :  { %2685 = vmatpush3.bf16.msra.mxu0 %v2684_v2 }
 0x981   :  { %2692 = vmatprep.subr.bf16.mxu0 %v3008_v7 }
 0x983   :  { %2564 = vmatmul.mubr.msk.f32.vlgmr.msra.gmra.mrb[10].mxu0 %vm133_vm0, %v1226_v54 }
 0x984   :  { %2694 = vmatpush3.bf16.msra.mxu0 %v2693_v3  ;;  %2581 = vmatprep.mubr.msk.f32.mxu0 %vm3007_vm3, %v3005_v8  ;;  %v2711_v3 = vpack.c.bf16 %v2389_v23, %v2388_v47 }
 0x985   :  { %2695 = vmatprep.subr.bf16.mxu0 %v3008_v7 }
 0x987   :  { %2582 = vmatmul.mubr.f32.vlgmr.msra.gmra.mrb[12].mxu0 %v3005_v8 }
 0x988   :  { %2592 = vmatprep.mubr.msk.f32.mxu0 %vm3007_vm3, %v3005_v8  ;;  %2697 = vmatpush3.bf16.msra.mxu0 %v2696_v33  ;;  %v2098_v33 = vld [vmem:[#allocation11 + $0x8] sm:$0xff] }
 0x989   :  { %2698 = vmatprep.subr.bf16.mxu0 %v3008_v7 }
 0xa4a   :  { %v1051_v12 = vpop.f32.mrb[6].mxu0 }
 0xa4b   :  { %v2538_v13 = vpop.f32.mrb[7].mxu0 }
 0xa4e   :  { %v1131_v14 = vpop.f32.mrb[8].mxu0 }
 0xa4f   :  { %v1301_v15 = vrot.slane %v1131_v14, 7  ;;  %v2543_v16 = vpop.f32.mrb[9].mxu0  ;;  %v1930_v14 = vld [vmem:[#allocation10] sm:$0xff] }
 0xa51   :  { %v1302_v17 = vsel %vm246_vm1, %v1301_v15, %v1051_v12  ;;  %v1931_v15 = vld [vmem:[#allocation10 + $0x8] sm:$0xff]  ;;  %vm1499_vm1 = vcmask 123904  }
 0xa52   :  { %2575 = vmatmul.mubr.msk.f32.vlgmr.msra.gmra.mrb[10].mxu1 %vm133_vm0, %v1302_v17  ;;  %v2714_v16 = vpack.c.bf16 %v1931_v15, %v1930_v14 }
 0xa53   :  { %2599 = vmatprep.mubr.msk.f32.mxu1 %vm3007_vm3, %v3005_v8  ;;  %2703 = vmatpush3.bf16.msra.mxu1 %v2702_v46 }
 0xa54   :  { %2704 = vmatprep.subr.bf16.mxu1 %v3008_v7 }
 0xa56   :  { %v1295_v18 = vpop.f32.mrb[10].mxu0 }
 0xa57   :  { %v2565_v19 = vpop.f32.mrb[11].mxu0 }
 0xa5a   :  { %v3350_v22 = vpop.f32.mrb[12].mxu0 }
 0xa5b   :  { %v3354_v24 = vadd.f32 %v3350_v22, %v3280_v44  ;;  %v2583_v25 = vpop.f32.mrb[13].mxu0  ;;  %v1511_v44 = vld [vmem:[%s3533_s5 + $0x10] sm:$0xff] }
 0xa5c   :  { %v2699_v35 = vpack.c.bf16 %v1512_v34, %v1511_v44  ;;  %v2097_v44 = vld [vmem:[#allocation11] sm:$0xff] }
 0xa5d   :  { %v1453_v26 = vmul.f32 0.5, %v3354_v24  ;;  %v2716_v34 = vpack.c.bf16 %v2098_v33, %v2097_v44 }
 0xa5e   :  { %2700 = vmatpush3.bf16.msra.mxu0 %v2699_v35 }
 0xa5f   :  { %v1454_v27 = vmul.f32 1.442695, %v1453_v26  ;;  %2710 = vmatprep.subr.bf16.mxu0 %v3008_v7 }
 0xa61   :  { %2799 = vpow2.f32 %v1454_v27 }
 0xa6b   :  { %v2800_v28 = vpop.eup %2799 }
 0xa6c   :  { %1457 = vrot.lane.b32.xlu1 %v2800_v28, %s3009_s9 }
 0xade   :  { %v1458_v37 = vpop.permute.xlu1 %1457 }
 0xadf   :  { %v1460_v38 = vmul.f32 %v1458_v37, %v1452_v36  ;;  %v2006_v36 = vld [vmem:[%s3539_s11 + $0x8] sm:$0x3f] }
 0xae1   :  { %v3373_v39 = vadd.f32 %v1460_v38, %v3354_v24  ;;  %v2099_v38 = vld [vmem:[#allocation11 + $0x10] sm:$0xff] }
 0xae3   :  { %1505 = vrot.lane.b32.xlu1 %v3373_v39, %s2994_s19 }
 0xb25   :  { %v1371_v40 = vpop.f32.mrb[10].mxu1 }
 0xb26   :  { %v2576_v41 = vpop.f32.mrb[11].mxu1 }
 0xb27   :  { %v2093_v41 = vld [vmem:[%s3536_s8] sm:$0xff] }
 0xb55   :  { %v1506_v20 = vpop.permute.xlu1 %1505 }
 0xb56   :  { %v1508_v42 = vsel %vm1377_vm5, 0.0, %v1506_v20 }
 0xb57   :  { %2593 = vmatmul.mubr.msk.f32.vlgmr.msra.gmra.mrb[14].mxu0 %vm133_vm0, %v1508_v42  ;;  %v2094_v42 = vld [vmem:[%s3536_s8 + $0x8] sm:$0x3f] }
 0xb58   :  { %2617 = vmatprep.mubr.msk.f32.mxu0 %vm3007_vm3, %v3005_v8  ;;  %2712 = vmatpush3.bf16.msra.mxu0 %v2711_v3 }
 0xb59   :  { %2713 = vmatprep.subr.bf16.mxu0 %v3008_v7 }
 0xc2a   :  { %v1582_v48 = vpop.f32.mrb[14].mxu0 }
 0xc2b   :  { %2801 = vtanh.f32 %v1582_v48  ;;  %v2594_v49 = vpop.f32.mrb[15].mxu0 }
 0xc35   :  { %v2802_v50 = vpop.eup %2801 }
 0xc36   :  { %2600 = vmatmul.mubr.msk.f32.vlgmr.msra.gmra.mrb[12].mxu1 %vm1377_vm5, %v2802_v50 }
 0xc37   :  { %2610 = vmatprep.mubr.msk.f32.mxu1 %vm3007_vm3, %v3005_v8  ;;  %2706 = vmatpush3.bf16.msra.mxu1 %v2705_v59 }
 0xc38   :  { %2707 = vmatprep.subr.bf16.mxu1 %v3008_v7 }
 0xc3b   :  { %2709 = vmatpush3.bf16.msra.mxu1 %v2708_v60 }
 0xd09   :  { %v3391_v51 = vpop.f32.mrb[12].mxu1 }
 0xd0a   :  { %v3394_v52 = vadd.f32 %v3391_v51, %v1295_v18  ;;  %v2601_v53 = vpop.f32.mrb[13].mxu1  ;;  %v1878_v18 = vld [vmem:[#allocation8 + $0x4] sm:$0x3]  ;;  %v1693_v3 = vsub.f32 0.0, %v3391_v51 }
 0xd0b   :  { %v3457_v53 = vld [vmem:[%s3538_s10] sm:$0xff] }
 0xd0c   :  { %v1666_v54 = vmul.f32 0.5, %v3394_v52  ;;  %vm2225_vm12 = vcmp.ne.s32.totalorder %v3457_v53, 0 }
 0xd0e   :  { %v1667_v55 = vmul.f32 1.442695, %v1666_v54  ;;  %v3463_v54 = vld [vmem:[%s3538_s10 + $0x8] sm:$0x3f]  ;;  %s3010_s10 = smov 96  }
 0xd0f   :  { %vm2226_vm11 = vcmp.ne.s32.totalorder %v3463_v54, 0 }
 0xd10   :  { %2803 = vpow2.f32 %v1667_v55 }
 0xd1a   :  { %v2804_v32 = vpop.eup %2803 }
 0xd1b   :  { %1670 = vrot.lane.b32.xlu1 %v2804_v32, %s3009_s9 }
 0xd8d   :  { %v1671_v62 = vpop.permute.xlu1 %1670 }
 0xd8e   :  { %v1673_v63 = vmul.f32 %v1671_v62, %v1665_v61 }
 0xd90   :  { %v1674_v0 = vadd.f32 %v1673_v63, %v3394_v52 }
 0xd92   :  { %1717 = vrot.lane.b32.xlu1 %v1674_v0, %s2994_s19  ;;  %v1715_v26 = vadd.f32 %v1674_v0, %v3373_v39  ;;  %v2100_v39 = vld [vmem:[#allocation11 + $0x18] sm:$0xff] }
 0xe04   :  { %v1718_v1 = vpop.permute.xlu1 %1717 }
 0xe05   :  { %v1720_v2 = vsel %vm1377_vm5, %v2802_v50, %v1718_v1 }
 0xe06   :  { %2611 = vmatmul.mubr.msk.f32.vlgmr.msra.gmra.mrb[14].mxu1 %vm133_vm0, %v1720_v2 }
 0xe07   :  { %2629 = vmatprep.mubr.msk.f32.mxu1 %vm2007_vm6, %v2005_v30 }
 0xed9   :  { %v1795_v4 = vpop.f32.mrb[14].mxu1 }
 0xeda   :  { %2805 = vtanh.f32 %v1795_v4  ;;  %v2612_v5 = vpop.f32.mrb[15].mxu1  ;;  %v1694_v4 = vmul.f32 1.442695, %v1693_v3 }
 0xee4   :  { %v2806_v6 = vpop.eup %2805 }
 0xee5   :  { %2618 = vmatmul.mubr.msk.f32.vlgmr.msra.gmra.mrb[16].mxu0 %vm1377_vm5, %v2806_v6 }
 0xee6   :  { %2624 = vmatprep.mubr.msk.f32.mxu0 %vm3007_vm3, %v3005_v8  ;;  %2715 = vmatpush3.bf16.msra.mxu0 %v2714_v16  ;;  %v1480_v16 = vsub.f32 0.0, %v3350_v22 }
 0xee7   :  { %2717 = vmatprep.subr.bf16.mxu0 %v2716_v34 }
 0xfb8   :  { %v3425_v9 = vpop.f32.mrb[16].mxu0 }
 0xfb9   :  { %v3428_v10 = vadd.f32 %v3425_v9, %v1371_v40  ;;  %v2619_v11 = vpop.f32.mrb[17].mxu0  ;;  %v2720_v40 = vpack.c.bf16 %v2100_v39, %v2099_v38  ;;  %v1906_v5 = vsub.f32 0.0, %v3425_v9 }
 0xfbb   :  { %v1879_v12 = vmul.f32 0.5, %v3428_v10  ;;  %v1907_v6 = vmul.f32 1.442695, %v1906_v5 }
 0xfbd   :  { %v1880_v13 = vmul.f32 1.442695, %v1879_v12 }
 0xfbf   :  { %2807 = vpow2.f32 %v1880_v13 }
 0xfc9   :  { %v2808_v17 = vpop.eup %2807 }
 0xfca   :  { %1883 = vrot.lane.b32.xlu1 %v2808_v17, %s3009_s9 }
0x103c   :  { %v1884_v19 = vpop.permute.xlu1 %1883 }
0x103d   :  { %v1886_v25 = vmul.f32 %v1884_v19, %v1878_v18  ;;  %v1481_v18 = vmul.f32 1.442695, %v1480_v16 }
0x103f   :  { %v1887_v27 = vadd.f32 %v1886_v25, %v3428_v10 }
0x1041   :  { %v1928_v28 = vadd.f32 %v1887_v27, %v1715_v26 }
0x1043   :  { %v1929_v29 = vmul.f32 0.33333334, %v1928_v28 }
0x1045   :  { %2625 = vmatmul.mubr.msk.f32.vlgmr.msra.gmra.mrb[18].mxu0 %vm1377_vm5, %v1929_v29  ;;  %vm2323_vm5 = vcmp.eq.s32.totalorder %v3198_v21, 3 }
0x1046   :  { %2719 = vmatpush3.bf16.msra.mxu0 %v2716_v34 }
0x1047   :  { %2721 = vmatprep.subr.bf16.mxu0 %v2720_v40 }
0x104a   :  { %2723 = vmatpush3.bf16.msra.mxu0 %v2720_v40 }
0x1118   :  { %v2001_v35 = vpop.f32.mrb[18].mxu0 }
0x1119   :  { %v2626_v37 = vpop.f32.mrb[19].mxu0  ;;  %2627 = vmatprep.subr.msk.mxu1 %vm2014_vm7, %v2001_v35 }
0x111a   :  { %2628 = vmatpush3.msk.msra.mxu1 %vm2014_vm7, %v2001_v35  ;;  %v2399_v35 = vsel %vm2226_vm11, 1.0, %v3005_v8  ;;  %v2398_v37 = vsel %vm2225_vm12, 1.0, %v3005_v8 }
0x111b   :  { %2630 = vmatmul.mubr.msk.f32.vlgmr.msra.gmra.mrb[16].mxu1 %vm2007_vm6, %v2006_v36  ;;  %2724 = vmatprep.subr.bf16.mxu1 %v3008_v7  ;;  %vm2331_vm6 = vcmask 25600  }
0x111c   :  { %2647 = vmatprep.mubr.msk.f32.mxu1 %vm3007_vm3, %v3005_v8  ;;  %v2235_v8 = vld [vmem:[%s3540_s12] sm:$0x3]  ;;  %s3012_s12 = smov 80   ;;  %vm2317_vm3 = vcmp.eq.s32.totalorder %v3198_v21, 1 }
0x11ee   :  { %v2631_v20 = vpop.f32.mrb[16].mxu1 }
0x11ef   :  { %v2084_v43 = vpop.f32.mrb[17].mxu1  ;;  %v2096_v7 = vadd.f32 %v2631_v20, %v2094_v42 }
0x11f0   :  { %v2095_v45 = vadd.f32 %v2093_v41, %v2084_v43 }
0x11f2   :  { %2640 = vmatprep.mubr.msk.f32.mxu0 %vm133_vm0, %v2095_v45 }
0x11f3   :  { %2641 = vmatmul.mubr.msk.f32.vlgmr.msra.gmra.mrb[20].mxu0 %vm133_vm0, %v2096_v7 }
0x12c6   :  { %v2642_v46 = vpop.f32.mrb[20].mxu0 }
0x12c7   :  { %v2173_v48 = vpop.f32.mrb[21].mxu0  ;;  %v2186_v49 = vsel %vm2185_vm8, %v2642_v46, -inf }
0x12c8   :  { %2187 = vmax.xlane.f32.xlu1 %v2186_v49  ;;  %v2182_v50 = vsel %vm133_vm0, %v2173_v48, -inf  ;;  %v1472_v49 = vmul.f32 1.442695, %v3354_v24 }
0x12c9   :  { %2183 = vmax.xlane.f32.xlu0 %v2182_v50  ;;  %v1898_v50 = vmul.f32 1.442695, %v3428_v10 }
0x12df   :  { %2210 = vperm.xlu0 %2750, %v3457_v53  }
0x12e3   :  { %2213 = vperm.xlu0 %2750, %v3463_v54  }
0x1355   :  { %v2188_v55 = vpop.xlane.xlu1 %2187 }
0x1356   :  { %v2190_v56 = vsub.f32 %v2642_v46, %v2188_v55  ;;  %v2184_v57 = vpop.xlane.xlu0 %2183 }
0x1357   :  { %v2189_v58 = vsub.f32 %v2173_v48, %v2184_v57 }
0x1358   :  { %v2193_v59 = vmul.f32 1.442695, %v2190_v56 }
0x1359   :  { %v2191_v31 = vmul.f32 1.442695, %v2189_v58 }
0x135a   :  { %2809 = vpow2.f32 %v2193_v59 }
0x135b   :  { %2811 = vpow2.f32 %v2191_v31 }
0x135c   :  { %2813 = vpow2.f32 %v1694_v4 }
0x135d   :  { %2815 = vpow2.f32 %v1907_v6 }
0x135e   :  { %v2211_v60 = vpop.permute.xlu0 %2210 }
0x135f   :  { %vm2215_vm9 = vcmp.eq.s32.totalorder %v3198_v21, %v2211_v60 }
0x1360   :  { %v2217_v1 = vsel %vm2215_vm9, %v2173_v48, 0.0  ;;  %v1685_v48 = vmul.f32 1.442695, %v3394_v52 }
0x1361   :  { %v2219_v2 = vsel %vm133_vm0, %v2217_v1, 0.0 }
0x1362   :  { %v2214_v61 = vpop.permute.xlu0 %2213 }
0x1363   :  { %vm2216_vm10 = vcmp.eq.s32.totalorder %v3198_v21, %v2214_v61 }
0x1364   :  { %v2810_v32 = vpop.eup %2809  ;;  %v2218_v47 = vsel %vm2216_vm10, %v2642_v46, 0.0 }
0x1365   :  { %v2812_v62 = vpop.eup %2811  ;;  %v2198_v63 = vsel %vm2185_vm8, %v2810_v32, 0.0  ;;  %v2222_v23 = vsel %vm2185_vm8, %v2218_v47, 0.0 }
0x1366   :  { %2199 = vadd.xlane.f32.xlu1 %v2198_v63  ;;  %v2195_v0 = vsel %vm133_vm0, %v2812_v62, 0.0  ;;  %v2814_v11 = vpop.eup %2813  ;;  %vm2236_vm0 = vcmask 113664  }
0x1367   :  { %2196 = vadd.xlane.f32.xlu0 %v2195_v0  ;;  %v2816_v12 = vpop.eup %2815 }
0x136a   :  { %2220 = vadd.xlane.f32.xlu1 %v2219_v2 }
0x136e   :  { %2223 = vadd.xlane.f32.xlu1 %v2222_v23 }
0x137d   :  { %1676 = vrot.lane.b32.xlu0 %v3391_v51, %s3010_s10 }
0x137f   :  { %1463 = vrot.lane.b32.xlu1 %v3350_v22, %s3010_s10 }
0x1381   :  { %1697 = vrot.lane.b32.xlu0 %v2814_v11, %s3010_s10 }
0x1383   :  { %1889 = vrot.lane.b32.xlu1 %v3425_v9, %s3010_s10 }
0x1385   :  { %1910 = vrot.lane.b32.xlu0 %v2816_v12, %s3010_s10 }
0x1389   :  { %1681 = vrot.lane.b32.xlu0 %v3394_v52, %s2997_s2 }
0x13f3   :  { %v2200_v13 = vpop.xlane.xlu1 %2199 }
0x13f4   :  { %2817 = vlog2.f32 %v2200_v13  ;;  %v2197_v14 = vpop.xlane.xlu0 %2196 }
0x13f5   :  { %2819 = vlog2.f32 %v2197_v14 }
0x13f6   :  { %2821 = vpow2.f32 %v1481_v18 }
0x13f7   :  { %v2221_v15 = vpop.xlane.xlu1 %2220  ;;  %2823 = vpow2.f32 %v1685_v48 }
0x13f8   :  { %v1677_v27 = vpop.permute.xlu0 %1676  ;;  %2825 = vpow2.f32 %v1472_v49 }
0x13f9   :  { %v1679_v34 = vsub.f32 %v3394_v52, %v1677_v27  ;;  %2827 = vpow2.f32 %v1898_v50 }
0x13fb   :  { %v2224_v17 = vpop.xlane.xlu1 %2223  ;;  %v1687_v20 = vmul.f32 %v1679_v34, %v1679_v34 }
0x13fc   :  { %v1698_v58 = vpop.permute.xlu0 %1697 }
0x13fe   :  { %v2818_v19 = vpop.eup %2817 }
0x13ff   :  { %v2820_v25 = vpop.eup %2819  ;;  %v2204_v26 = vmul.f32 0.6931472, %v2818_v19  ;;  %v1464_v28 = vpop.permute.xlu1 %1463 }
0x1400   :  { %v2202_v29 = vmul.f32 0.6931472, %v2820_v25  ;;  %v1466_v30 = vsub.f32 %v3354_v24, %v1464_v28  ;;  %v2822_v7 = vpop.eup %2821  ;;  %v1911_v62 = vpop.permute.xlu0 %1910 }
0x1401   :  { %v2206_v44 = vadd.f32 %v2204_v26, %v2188_v55  ;;  %v2824_v54 = vpop.eup %2823 }
0x1402   :  { %v2205_v33 = vadd.f32 %v2202_v29, %v2184_v57  ;;  %v1474_v36 = vmul.f32 %v1466_v30, %v1466_v30  ;;  %v2826_v57 = vpop.eup %2825 }
0x1403   :  { %v2232_v38 = vsub.f32 %v2206_v44, %v2224_v17  ;;  %v1890_v42 = vpop.permute.xlu1 %1889 }
0x1404   :  { %v2231_v39 = vsub.f32 %v2205_v33, %v2221_v15  ;;  %1476 = vrot.lane.b32.xlu1 %v1474_v36, %s2994_s19  ;;  %v1892_v45 = vsub.f32 %v3428_v10, %v1890_v42  ;;  %v1682_v0 = vpop.permute.xlu0 %1681 }
0x1405   :  { %v2234_v40 = vmul.f32 %v2399_v35, %v2232_v38  ;;  %v1684_v2 = vsub.f32 %v3391_v51, %v1682_v0 }
0x1406   :  { %v2233_v41 = vmul.f32 %v2398_v37, %v2231_v39  ;;  %v1900_v46 = vmul.f32 %v1892_v45, %v1892_v45 }
0x1408   :  { %v2725_v43 = vpack.c.bf16 %v2234_v40, %v2233_v41  ;;  %1689 = vrot.lane.b32.xlu1 %v1687_v20, %s2994_s19 }
0x140a   :  { %2727 = vmatpush3.bf16.msk.msra.mxu1 %vm2726_vm15, %v2725_v43 }
0x140c   :  { %1484 = vrot.lane.b32.xlu1 %v2822_v7, %s3010_s10 }
0x140d   :  { %2648 = vmatmul.mubr.msk.f32.vlgmr.msra.gmra.mrb[18].mxu1 %vm2236_vm0, %v2235_v8 }
0x1410   :  { %1902 = vrot.lane.b32.xlu1 %v1900_v46, %s2994_s19  ;;  %s3013_s19 = smov [#allocation13]  }
0x1414   :  { %1468 = vrot.lane.b32.xlu1 %v3354_v24, %s2997_s2  ;;  %v2828_v24 = vpop.eup %2827 }
0x1476   :  { %v1477_v53 = vpop.permute.xlu1 %1476 }
0x1477   :  { %v1479_v59 = vadd.f32 %v2826_v57, %v1477_v53 }
0x147a   :  { %v1690_v55 = vpop.permute.xlu1 %1689 }
0x147b   :  { %v1692_v56 = vadd.f32 %v2824_v54, %v1690_v55 }
0x147d   :  { %v1700_v31 = vmul.f32 %v1698_v58, %v1692_v56 }
0x147e   :  { %v1485_v60 = vpop.permute.xlu1 %1484 }
0x147f   :  { %v1487_v32 = vmul.f32 %v1485_v60, %v1479_v59  ;;  %1702 = vrot.lane.b32.xlu0 %v1700_v31, %s2997_s2 }
0x1481   :  { %1489 = vrot.lane.b32.xlu1 %v1487_v32, %s2997_s2 }
0x1482   :  { %v1903_v52 = vpop.permute.xlu1 %1902 }
0x1483   :  { %v1905_v61 = vadd.f32 %v2828_v24, %v1903_v52 }
0x1485   :  { %1894 = vrot.lane.b32.xlu1 %v3428_v10, %s2997_s2  ;;  %v1913_v63 = vmul.f32 %v1911_v62, %v1905_v61 }
0x1486   :  { %v1469_v1 = vpop.permute.xlu1 %1468 }
0x1487   :  { %1915 = vrot.lane.b32.xlu0 %v1913_v63, %s2997_s2  ;;  %v1471_v23 = vsub.f32 %v3350_v22, %v1469_v1  ;;  %s2339_s2 = sshll.u32 %s3013_s19, 4  ;;  %s2340_s2 = int_to_ptr.vmem [resolvable:$true] %s2339_s2 }
0x1488   :  { %s2961_s7 = scalar_lea.vmem %s2340_s2, 32  ;;  %p2966_p7 = scmp.lt.s32.totalorder %s2340_s2, %s2340_s2 }
0x1489   :  { %p2962_p6 = scmp.ne.s32.totalorder %s2340_s2, %s2961_s7  ;;  %p2967_p8 = scmp.lt.s32.totalorder %s2961_s7, %s2961_s7 }
0x148b   :  { %p2968_p9 = por %p2967_p8, %p2966_p7 }
0x148d   :  { %p2969_p10 = pnand %p2968_p9, %p2962_p6 }
0x14e0   :  { %v2310_v11 = vpop.f32.mrb[18].mxu1 }
0x14e1   :  { %v2649_v12 = vpop.f32.mrb[19].mxu1 }
0x14f1   :  { %v1703_v47 = vpop.permute.xlu0 %1702 }
0x14f2   :  { %v1705_v3 = vadd.f32 %v1703_v47, %v1684_v2 }
0x14f3   :  { %v1490_v4 = vpop.permute.xlu1 %1489 }
0x14f4   :  { %v2382_v5 = vadd.f32 -1.0, %v1705_v3  ;;  %v1492_v6 = vadd.f32 %v1490_v4, %v1471_v23 }
0x14f6   :  { %v1707_v13 = vmul.f32 0.5, %v2382_v5  ;;  %v2377_v14 = vadd.f32 -1.0, %v1492_v6 }
0x14f7   :  { %v1895_v15 = vpop.permute.xlu1 %1894 }
0x14f8   :  { %v1494_v10 = vmul.f32 0.5, %v2377_v14  ;;  %v1897_v16 = vsub.f32 %v3425_v9, %v1895_v15  ;;  %1709 = vrot.lane.b32.xlu0 %v1707_v13, %s3012_s12 }
0x14f9   :  { %v1916_v17 = vpop.permute.xlu0 %1915 }
0x14fa   :  { %v1918_v18 = vadd.f32 %v1916_v17, %v1897_v16  ;;  %1496 = vrot.lane.b32.xlu1 %v1494_v10, %s3012_s12 }
0x14fc   :  { %v2391_v51 = vadd.f32 -1.0, %v1918_v18 }
0x14fe   :  { %v1920_v19 = vmul.f32 0.5, %v2391_v51 }
0x1500   :  { %1922 = vrot.lane.b32.xlu1 %v1920_v19, %s3012_s12 }
0x156a   :  { %v1710_v22 = vpop.permute.xlu0 %1709 }
0x156b   :  { %v1712_v25 = vsel %vm1499_vm1, %v1710_v22, 0.0 }
0x156c   :  { %v1497_v26 = vpop.permute.xlu1 %1496  ;;  %1713 = vadd.xlane.f32.xlu1 %v1712_v25 }
0x156d   :  { %v1500_v27 = vsel %vm1499_vm1, %v1497_v26, 0.0 }
0x156e   :  { %1501 = vadd.xlane.f32.xlu0 %v1500_v27 }
0x1572   :  { %v1923_v28 = vpop.permute.xlu1 %1922 }
0x1573   :  { %v1925_v29 = vsel %vm1499_vm1, %v1923_v28, 0.0 }
0x1574   :  { %1926 = vadd.xlane.f32.xlu0 %v1925_v29 }
0x158a   :  { %2326 = vperm.xlu0 %2750, %v2310_v11  }
0x15f9   :  { %v1714_v30 = vpop.xlane.xlu1 %1713 }
0x15fa   :  { %v2318_v34 = vsel %vm2317_vm3, %v1714_v30, 0.0 }
0x15fb   :  { %v1502_v9 = vpop.xlane.xlu0 %1501 }
0x15fc   :  { %v2315_v33 = vsel %vm2314_vm2, %v1502_v9, 0.0 }
0x15fd   :  { %v2319_v36 = vadd.f32 %v2318_v34, %v2315_v33 }
0x1601   :  { %v1927_v44 = vpop.xlane.xlu0 %1926 }
0x1602   :  { %v2321_v35 = vsel %vm2320_vm4, %v1927_v44, 0.0 }
0x1603   :  { %v2322_v37 = vadd.f32 %v2321_v35, %v2319_v36 }
0x1609   :  { %v2327_v38 = vpop.permute.xlu0 %2326 }
0x160a   :  { %v2329_v39 = vsel %vm2323_vm5, %v2327_v38, 0.0 }
0x160b   :  { %v2330_v40 = vadd.f32 %v2329_v39, %v2322_v37 }
0x160d   :  { %2332 = vst.msk [vmem:[#allocation13] sm:$0x3] %vm2331_vm6, %v2330_v40 }
0x160e   :  { %2972 = shalt.err (!%p2969_p10)
}
0x160f   :  { %s2973_s23 = scalar_lea.hbm %s3541_s13, 32 }
0x1610   :  { %p2974_p11 = scmp.ne.s32.totalorder %s3541_s13, %s2973_s23  ;;  %p2977_p12 = scmp.lt.u32.totalorder %s2973_s23, %s3541_s13 }
0x1612   :  { %p2979_p13 = pnand %p2977_p12, %p2974_p11 }
0x1614   :  { %2982 = shalt.err (!%p2979_p13)
}
0x1615   :  { %2342 = dma.vmem_to_hbm [thread:$0]  %s2340_s2, 32, %s3541_s13, [#allocation4]  }
0x1616   :  { %2991 = dma.done.wait [#allocation4], 32  }
0x1617   :  { %2992 = vsyncadd [#allocation4], 4294967264 }
0x1618   :  { %2346 = vsyncpa [#allocation3], 1 }
0x1619   :  { %2347 = vsyncpa [#allocation6], 1 }
0x161a   :  { %2348 = vsyncpa [#allocation9], 1 }
0x161b   :  { %2349 = vsyncpa [#allocation12], 1 }
0x161c   :  { %2350 = vsyncpa [#allocation4], 1 }

</bundles_post_ra>
